<compile_context>
chip_gen: v7x
topology: tpu7x:2x2x1
jax: 0.10.0
libtpu: 0.0.40
codegen_flags: <defaults>
</compile_context>

<pallas_src>
import jax
import jax.numpy as jnp
from jax.experimental import pallas as pl
from jax.experimental.pallas import tpu as pltpu


# ---------------------------------------------------------------------------
# Fused bidirectional LSTM recurrence kernel (time loop in-kernel).
# ---------------------------------------------------------------------------
def _bilstm_kernel(gx_ref, whh_ref, out_ref, hfin_ref, cfin_ref):
    T, Bt, _ = gx_ref.shape
    H = whh_ref.shape[0]

    # Resident recurrent weights (bf16), loaded once per grid step; halves are
    # lane-aligned slices of the packed (H, 8H) weight.
    whh = whh_ref[...]                       # (H, 8H) bf16
    whh_f = whh[:, 0:4 * H]                  # (H, 4H)
    whh_b = whh[:, 4 * H:8 * H]              # (H, 4H)

    def lstm_cell(gates, c):
        # PyTorch gate order [i, f, g, o]; all nonlinearities + state in f32.
        i = jax.nn.sigmoid(gates[:, 0 * H:1 * H])
        f = jax.nn.sigmoid(gates[:, 1 * H:2 * H])
        g = jnp.tanh(gates[:, 2 * H:3 * H])
        o = jax.nn.sigmoid(gates[:, 3 * H:4 * H])
        c_new = f * c + i * g
        h_new = o * jnp.tanh(c_new)
        return h_new, c_new

    def step(t, carry):
        h_f, c_f, h_b, c_b = carry

        # --- forward direction consumes time index t ---
        gates_f = gx_ref[t, :, 0:4 * H] + jnp.dot(
            h_f.astype(jnp.bfloat16), whh_f,
            preferred_element_type=jnp.float32)
        h_f, c_f = lstm_cell(gates_f, c_f)
        out_ref[t, :, 0:H] = h_f

        # --- backward direction consumes time index T-1-t ---
        # (time reversal via indexing; no jnp.flip HBM round-trips)
        tb = T - 1 - t
        gates_b = gx_ref[tb, :, 4 * H:8 * H] + jnp.dot(
            h_b.astype(jnp.bfloat16), whh_b,
            preferred_element_type=jnp.float32)
        h_b, c_b = lstm_cell(gates_b, c_b)
        out_ref[tb, :, H:2 * H] = h_b

        return h_f, c_f, h_b, c_b

    z = jnp.zeros((Bt, H), jnp.float32)
    h_f, c_f, h_b, c_b = jax.lax.fori_loop(0, T, step, (z, z, z, z),
                                           unroll=True)

    # Final states in PyTorch order: concat(hidden[-2]=fwd, hidden[-1]=bwd).
    hfin_ref[:, 0:H] = h_f
    hfin_ref[:, H:2 * H] = h_b
    cfin_ref[:, 0:H] = c_f
    cfin_ref[:, H:2 * H] = c_b


def _vmem_budget_bytes(T, B, H):
    """Explicit VMEM budget (inputs/outputs double-buffered by the pipeline)."""
    f32, bf16 = 4, 2
    gx = T * B * 8 * H * f32          # packed precomputed gates (both dirs)
    out = T * B * 2 * H * f32
    w = H * 8 * H * bf16              # packed recurrent weights (both dirs)
    fin = 2 * B * 2 * H * f32
    need = 2 * gx + 2 * out + 2 * w + 2 * fin
    return int(min(max(2 * need, 8 * 1024 * 1024), 48 * 1024 * 1024))


def _bilstm_pallas(gx, whh):
    """gx: (T, B, 8H) f32 precomputed gates (+bias) for both directions,
    [fwd | bwd] packed along the lane dim.  whh: (H, 8H) bf16 packed
    recurrent weights [W_hh_fwd.T | W_hh_bwd.T]."""
    T, B, G = gx.shape
    H = whh.shape[0]
    assert G == 8 * H and whh.shape[1] == 8 * H

    # Whole batch as one tile at these toy sizes; for large batch use a tile
    # that is a multiple of 8 sublanes (the "parallel" axis then shards across
    # TensorCores on multi-core chips).
    b_tile = B
    grid = (pl.cdiv(B, b_tile),)

    return pl.pallas_call(
        _bilstm_kernel,
        grid=grid,
        in_specs=[
            pl.BlockSpec((T, b_tile, 8 * H), lambda b: (0, b, 0)),
            pl.BlockSpec((H, 8 * H), lambda b: (0, 0)),
        ],
        out_specs=[
            pl.BlockSpec((T, b_tile, 2 * H), lambda b: (0, b, 0)),
            pl.BlockSpec((b_tile, 2 * H), lambda b: (b, 0)),
            pl.BlockSpec((b_tile, 2 * H), lambda b: (b, 0)),
        ],
        out_shape=[
            jax.ShapeDtypeStruct((T, B, 2 * H), jnp.float32),
            jax.ShapeDtypeStruct((B, 2 * H), jnp.float32),
            jax.ShapeDtypeStruct((B, 2 * H), jnp.float32),
        ],
        compiler_params=pltpu.CompilerParams(
            dimension_semantics=("parallel",),
            vmem_limit_bytes=_vmem_budget_bytes(T, B, H)),
    )(gx, whh)


# ---------------------------------------------------------------------------
# Parameters (mirrors nn.Embedding + nn.LSTM(bidirectional=True) shapes).
# ---------------------------------------------------------------------------
def init_encoder_params(key, input_dim, hidden_dim, embed_dim):
    ks = jax.random.split(key, 9)
    k_scale = 1.0 / jnp.sqrt(hidden_dim)
    u = lambda k, shape: jax.random.uniform(k, shape, jnp.float32,
                                            -k_scale, k_scale)
    return {
        "embedding": jax.random.normal(ks[0], (input_dim, embed_dim),
                                       jnp.float32),
        # forward direction
        "w_ih_f": u(ks[1], (4 * hidden_dim, embed_dim)),
        "w_hh_f": u(ks[2], (4 * hidden_dim, hidden_dim)),
        "b_ih_f": u(ks[3], (4 * hidden_dim,)),
        "b_hh_f": u(ks[4], (4 * hidden_dim,)),
        # backward direction
        "w_ih_b": u(ks[5], (4 * hidden_dim, embed_dim)),
        "w_hh_b": u(ks[6], (4 * hidden_dim, hidden_dim)),
        "b_ih_b": u(ks[7], (4 * hidden_dim,)),
        "b_hh_b": u(ks[8], (4 * hidden_dim,)),
    }


# ---------------------------------------------------------------------------
# Encoder.forward
# ---------------------------------------------------------------------------
def encoder_forward(params, x):
    """x: (T, B) int32 token indices.  Mirrors Encoder.forward (eval mode)."""
    T, B = x.shape
    E = params["embedding"].shape[1]
    H = params["w_hh_f"].shape[1]

    # Embedding lookup (gather) -- plain XLA glue.
    embedded = jnp.take(params["embedding"], x, axis=0)        # (T, B, E) f32
    # Dropout: eval-mode identity.

    # Hoisted input projection for BOTH directions as ONE large MXU matmul
    # over T*B rows (bf16 operands, f32 accumulation), instead of T tiny
    # per-step matmuls inside the recurrence.
    wih_cat = jnp.concatenate([params["w_ih_f"].T, params["w_ih_b"].T],
                              axis=1)                          # (E, 8H)
    gx = jnp.dot(embedded.reshape(T * B, E).astype(jnp.bfloat16),
                 wih_cat.astype(jnp.bfloat16),
                 preferred_element_type=jnp.float32).reshape(T, B, 8 * H)
    b_cat = jnp.concatenate([params["b_ih_f"] + params["b_hh_f"],
                             params["b_ih_b"] + params["b_hh_b"]])  # (8H,)
    gx = gx + b_cat                                            # (T, B, 8H) f32

    # Recurrent weights: transposed, packed, bf16 operands for the in-kernel
    # matmuls.
    whh_cat = jnp.concatenate([params["w_hh_f"].T, params["w_hh_b"].T],
                              axis=1).astype(jnp.bfloat16)     # (H, 8H)

    outputs, h_fin, c_fin = _bilstm_pallas(gx, whh_cat)

    hidden = h_fin[None]                                       # (1, B, 2H)
    cell = c_fin[None]                                         # (1, B, 2H)
    return outputs, (hidden, cell)


# ---------------------------------------------------------------------------
# Pure-JAX f32 reference (lax.scan) with identical semantics, for self-check.
# ---------------------------------------------------------------------------
def _reference_direction(emb, w_ih, w_hh, b_ih, b_hh):
    B = emb.shape[1]
    H = w_hh.shape[1]

    def cell(carry, x_t):
        h, c = carry
        g = x_t @ w_ih.T + h @ w_hh.T + b_ih + b_hh
        i = jax.nn.sigmoid(g[:, 0 * H:1 * H])
        f = jax.nn.sigmoid(g[:, 1 * H:2 * H])
        gg = jnp.tanh(g[:, 2 * H:3 * H])
        o = jax.nn.sigmoid(g[:, 3 * H:4 * H])
        c = f * c + i * gg
        h = o * jnp.tanh(c)
        return (h, c), h

    init = (jnp.zeros((B, H), jnp.float32), jnp.zeros((B, H), jnp.float32))
    (hT, cT), ys = jax.lax.scan(cell, init, emb)
    return ys, hT, cT


def encoder_reference(params, x):
    emb = jnp.take(params["embedding"], x, axis=0)
    yf, hf, cf = _reference_direction(emb, params["w_ih_f"], params["w_hh_f"],
                                      params["b_ih_f"], params["b_hh_f"])
    yb_rev, hb, cb = _reference_direction(emb[::-1], params["w_ih_b"],
                                          params["w_hh_b"], params["b_ih_b"],
                                          params["b_hh_b"])
    yb = yb_rev[::-1]
    outputs = jnp.concatenate([yf, yb], axis=-1)
    hidden = jnp.concatenate([hf, hb], axis=1)[None]
    cell = jnp.concatenate([cf, cb], axis=1)[None]
    return outputs, (hidden, cell)


if __name__ == "__main__":
    INPUT_DIM = 16     # vocab size
    EMBED_DIM = 8
    HIDDEN_DIM = 32
    SEQ_LEN = 8
    BATCH = 2

    key = jax.random.PRNGKey(0)
    k_params, k_x = jax.random.split(key)

    params = init_encoder_params(k_params, INPUT_DIM, HIDDEN_DIM, EMBED_DIM)
    x = jax.random.randint(k_x, (SEQ_LEN, BATCH), 0, INPUT_DIM, jnp.int32)

    outputs, (hidden, cell) = jax.jit(encoder_forward)(params, x)
    jax.block_until_ready((outputs, hidden, cell))

    assert outputs.shape == (SEQ_LEN, BATCH, 2 * HIDDEN_DIM)
    assert hidden.shape == (1, BATCH, 2 * HIDDEN_DIM)
    assert cell.shape == (1, BATCH, 2 * HIDDEN_DIM)

    # Numerical self-check against the f32 lax.scan reference (loose tolerance
    # because the kernel uses bf16 matmul operands with f32 accumulation).
    ref_out, (ref_h, ref_c) = jax.jit(encoder_reference)(params, x)
    err_o = float(jnp.max(jnp.abs(outputs - ref_out)))
    err_h = float(jnp.max(jnp.abs(hidden - ref_h)))
    err_c = float(jnp.max(jnp.abs(cell - ref_c)))
    assert jnp.allclose(outputs, ref_out, atol=5e-2, rtol=5e-2), err_o
    assert jnp.allclose(hidden, ref_h, atol=5e-2, rtol=5e-2), err_h
    assert jnp.allclose(cell, ref_c, atol=5e-2, rtol=5e-2), err_c

    print("KERNEL_OK")
</pallas_src>

<mosaic_0001>
module attributes {stable_mosaic.version = 11 : i64} {
  func.func @_bilstm_kernel(%arg0: i32, %arg1: memref<8x2x256xf32, #tpu.memory_space<vmem>>, %arg2: memref<32x256xbf16, #tpu.memory_space<vmem>>, %arg3: memref<8x2x64xf32, #tpu.memory_space<vmem>>, %arg4: memref<2x64xf32, #tpu.memory_space<vmem>>, %arg5: memref<2x64xf32, #tpu.memory_space<vmem>>) attributes {dimension_semantics = [#tpu.dimension_semantics<parallel>], iteration_bounds = array<i64: 1>, scalar_prefetch = 0 : i64, scratch_operands = 0 : i64, tpu.core_type = #tpu.core_type<tc>, window_params = [{transform_indices = @transform_0, window_bounds = array<i64: 8, 2, 256>}, {pipeline_mode = #tpu.pipeline_mode<synchronous>, transform_indices = @transform_1, window_bounds = array<i64: 32, 256>}, {transform_indices = @transform_2, window_bounds = array<i64: 8, 2, 64>}, {transform_indices = @transform_3, window_bounds = array<i64: 2, 64>}, {transform_indices = @transform_4, window_bounds = array<i64: 2, 64>}]} {
    %c0 = arith.constant 0 : index
    %c0_0 = arith.constant 0 : index
    %0 = vector.load %arg2[%c0, %c0_0] : memref<32x256xbf16, #tpu.memory_space<vmem>>, vector<32x256xbf16>
    %1 = vector.extract_strided_slice %0 {offsets = [0, 0], sizes = [32, 128], strides = [1, 1]} : vector<32x256xbf16> to vector<32x128xbf16>
    %2 = vector.extract_strided_slice %0 {offsets = [0, 128], sizes = [32, 128], strides = [1, 1]} : vector<32x256xbf16> to vector<32x128xbf16>
    %cst = arith.constant 0.000000e+00 : f32
    %3 = vector.broadcast %cst : f32 to vector<2x32xf32>
    %c0_i32 = arith.constant 0 : i32
    %4 = arith.index_cast %c0_i32 : i32 to index
    %c0_1 = arith.constant 0 : index
    %c0_2 = arith.constant 0 : index
    %5 = vector.load %arg1[%4, %c0_1, %c0_2] : memref<8x2x256xf32, #tpu.memory_space<vmem>>, vector<1x2x128xf32>
    %6 = vector.shape_cast %5 : vector<1x2x128xf32> to vector<2x128xf32>
    %7 = arith.truncf %3 : vector<2x32xf32> to vector<2x32xbf16>
    %cst_3 = arith.constant dense<0.000000e+00> : vector<2x128xf32>
    %8 = tpu.matmul %7, %1, %cst_3 {dimension_numbers = #tpu.dot_dimension_numbers<[1], [0], [0], [1], [0, 0, 1, 1], [], []>} : vector<2x32xbf16>, vector<32x128xbf16>, vector<2x128xf32> -> vector<2x128xf32>
    %9 = arith.addf %6, %8 : vector<2x128xf32>
    %10 = vector.extract_strided_slice %9 {offsets = [0, 0], sizes = [2, 32], strides = [1, 1]} : vector<2x128xf32> to vector<2x32xf32>
    %11 = arith.negf %10 : vector<2x32xf32>
    %12 = math.exp %11 : vector<2x32xf32>
    %cst_4 = arith.constant 1.000000e+00 : f32
    %13 = vector.broadcast %cst_4 : f32 to vector<2x32xf32>
    %14 = arith.addf %13, %12 : vector<2x32xf32>
    %15 = arith.divf %13, %14 : vector<2x32xf32>
    %16 = vector.extract_strided_slice %9 {offsets = [0, 32], sizes = [2, 32], strides = [1, 1]} : vector<2x128xf32> to vector<2x32xf32>
    %17 = arith.negf %16 : vector<2x32xf32>
    %18 = math.exp %17 : vector<2x32xf32>
    %cst_5 = arith.constant 1.000000e+00 : f32
    %19 = vector.broadcast %cst_5 : f32 to vector<2x32xf32>
    %20 = arith.addf %19, %18 : vector<2x32xf32>
    %21 = arith.divf %19, %20 : vector<2x32xf32>
    %22 = vector.extract_strided_slice %9 {offsets = [0, 64], sizes = [2, 32], strides = [1, 1]} : vector<2x128xf32> to vector<2x32xf32>
    %23 = math.tanh %22 : vector<2x32xf32>
    %24 = vector.extract_strided_slice %9 {offsets = [0, 96], sizes = [2, 32], strides = [1, 1]} : vector<2x128xf32> to vector<2x32xf32>
    %25 = arith.negf %24 : vector<2x32xf32>
    %26 = math.exp %25 : vector<2x32xf32>
    %cst_6 = arith.constant 1.000000e+00 : f32
    %27 = vector.broadcast %cst_6 : f32 to vector<2x32xf32>
    %28 = arith.addf %27, %26 : vector<2x32xf32>
    %29 = arith.divf %27, %28 : vector<2x32xf32>
    %30 = arith.mulf %21, %3 : vector<2x32xf32>
    %31 = arith.mulf %15, %23 : vector<2x32xf32>
    %32 = arith.addf %30, %31 : vector<2x32xf32>
    %33 = math.tanh %32 : vector<2x32xf32>
    %34 = arith.mulf %29, %33 : vector<2x32xf32>
    %35 = arith.index_cast %c0_i32 : i32 to index
    %c0_7 = arith.constant 0 : index
    %c0_8 = arith.constant 0 : index
    %36 = vector.load %arg3[%35, %c0_7, %c0_8] : memref<8x2x64xf32, #tpu.memory_space<vmem>>, vector<1x2x32xf32>
    %37 = vector.shape_cast %36 : vector<1x2x32xf32> to vector<2x32xf32>
    %38 = vector.shape_cast %34 : vector<2x32xf32> to vector<1x2x32xf32>
    tpu.vector_store %arg3[%35, %c0_7, %c0_8], %38 {strides = array<i32>} : memref<8x2x64xf32, #tpu.memory_space<vmem>>, vector<1x2x32xf32>,
    %c7_i32 = arith.constant 7 : i32
    %39 = arith.subi %c7_i32, %c0_i32 : i32
    %40 = arith.index_cast %39 : i32 to index
    %c0_9 = arith.constant 0 : index
    %c128 = arith.constant 128 : index
    %41 = vector.load %arg1[%40, %c0_9, %c128] : memref<8x2x256xf32, #tpu.memory_space<vmem>>, vector<1x2x128xf32>
    %42 = vector.shape_cast %41 : vector<1x2x128xf32> to vector<2x128xf32>
    %43 = arith.truncf %3 : vector<2x32xf32> to vector<2x32xbf16>
    %cst_10 = arith.constant dense<0.000000e+00> : vector<2x128xf32>
    %44 = tpu.matmul %43, %2, %cst_10 {dimension_numbers = #tpu.dot_dimension_numbers<[1], [0], [0], [1], [0, 0, 1, 1], [], []>} : vector<2x32xbf16>, vector<32x128xbf16>, vector<2x128xf32> -> vector<2x128xf32>
    %45 = arith.addf %42, %44 : vector<2x128xf32>
    %46 = vector.extract_strided_slice %45 {offsets = [0, 0], sizes = [2, 32], strides = [1, 1]} : vector<2x128xf32> to vector<2x32xf32>
    %47 = arith.negf %46 : vector<2x32xf32>
    %48 = math.exp %47 : vector<2x32xf32>
    %cst_11 = arith.constant 1.000000e+00 : f32
    %49 = vector.broadcast %cst_11 : f32 to vector<2x32xf32>
    %50 = arith.addf %49, %48 : vector<2x32xf32>
    %51 = arith.divf %49, %50 : vector<2x32xf32>
    %52 = vector.extract_strided_slice %45 {offsets = [0, 32], sizes = [2, 32], strides = [1, 1]} : vector<2x128xf32> to vector<2x32xf32>
    %53 = arith.negf %52 : vector<2x32xf32>
    %54 = math.exp %53 : vector<2x32xf32>
    %cst_12 = arith.constant 1.000000e+00 : f32
    %55 = vector.broadcast %cst_12 : f32 to vector<2x32xf32>
    %56 = arith.addf %55, %54 : vector<2x32xf32>
    %57 = arith.divf %55, %56 : vector<2x32xf32>
    %58 = vector.extract_strided_slice %45 {offsets = [0, 64], sizes = [2, 32], strides = [1, 1]} : vector<2x128xf32> to vector<2x32xf32>
    %59 = math.tanh %58 : vector<2x32xf32>
    %60 = vector.extract_strided_slice %45 {offsets = [0, 96], sizes = [2, 32], strides = [1, 1]} : vector<2x128xf32> to vector<2x32xf32>
    %61 = arith.negf %60 : vector<2x32xf32>
    %62 = math.exp %61 : vector<2x32xf32>
    %cst_13 = arith.constant 1.000000e+00 : f32
    %63 = vector.broadcast %cst_13 : f32 to vector<2x32xf32>
    %64 = arith.addf %63, %62 : vector<2x32xf32>
    %65 = arith.divf %63, %64 : vector<2x32xf32>
    %66 = arith.mulf %57, %3 : vector<2x32xf32>
    %67 = arith.mulf %51, %59 : vector<2x32xf32>
    %68 = arith.addf %66, %67 : vector<2x32xf32>
    %69 = math.tanh %68 : vector<2x32xf32>
    %70 = arith.mulf %65, %69 : vector<2x32xf32>
    %71 = arith.index_cast %39 : i32 to index
    %c0_14 = arith.constant 0 : index
    %c32 = arith.constant 32 : index
    %72 = vector.load %arg3[%71, %c0_14, %c32] : memref<8x2x64xf32, #tpu.memory_space<vmem>>, vector<1x2x32xf32>
    %73 = vector.shape_cast %72 : vector<1x2x32xf32> to vector<2x32xf32>
    %74 = vector.shape_cast %70 : vector<2x32xf32> to vector<1x2x32xf32>
    tpu.vector_store %arg3[%71, %c0_14, %c32], %74 {strides = array<i32>} : memref<8x2x64xf32, #tpu.memory_space<vmem>>, vector<1x2x32xf32>,
    %c1_i32 = arith.constant 1 : i32
    %75 = arith.index_cast %c1_i32 : i32 to index
    %c0_15 = arith.constant 0 : index
    %c0_16 = arith.constant 0 : index
    %76 = vector.load %arg1[%75, %c0_15, %c0_16] : memref<8x2x256xf32, #tpu.memory_space<vmem>>, vector<1x2x128xf32>
    %77 = vector.shape_cast %76 : vector<1x2x128xf32> to vector<2x128xf32>
    %78 = arith.truncf %34 : vector<2x32xf32> to vector<2x32xbf16>
    %cst_17 = arith.constant dense<0.000000e+00> : vector<2x128xf32>
    %79 = tpu.matmul %78, %1, %cst_17 {dimension_numbers = #tpu.dot_dimension_numbers<[1], [0], [0], [1], [0, 0, 1, 1], [], []>} : vector<2x32xbf16>, vector<32x128xbf16>, vector<2x128xf32> -> vector<2x128xf32>
    %80 = arith.addf %77, %79 : vector<2x128xf32>
    %81 = vector.extract_strided_slice %80 {offsets = [0, 0], sizes = [2, 32], strides = [1, 1]} : vector<2x128xf32> to vector<2x32xf32>
    %82 = arith.negf %81 : vector<2x32xf32>
    %83 = math.exp %82 : vector<2x32xf32>
    %cst_18 = arith.constant 1.000000e+00 : f32
    %84 = vector.broadcast %cst_18 : f32 to vector<2x32xf32>
    %85 = arith.addf %84, %83 : vector<2x32xf32>
    %86 = arith.divf %84, %85 : vector<2x32xf32>
    %87 = vector.extract_strided_slice %80 {offsets = [0, 32], sizes = [2, 32], strides = [1, 1]} : vector<2x128xf32> to vector<2x32xf32>
    %88 = arith.negf %87 : vector<2x32xf32>
    %89 = math.exp %88 : vector<2x32xf32>
    %cst_19 = arith.constant 1.000000e+00 : f32
    %90 = vector.broadcast %cst_19 : f32 to vector<2x32xf32>
    %91 = arith.addf %90, %89 : vector<2x32xf32>
    %92 = arith.divf %90, %91 : vector<2x32xf32>
    %93 = vector.extract_strided_slice %80 {offsets = [0, 64], sizes = [2, 32], strides = [1, 1]} : vector<2x128xf32> to vector<2x32xf32>
    %94 = math.tanh %93 : vector<2x32xf32>
    %95 = vector.extract_strided_slice %80 {offsets = [0, 96], sizes = [2, 32], strides = [1, 1]} : vector<2x128xf32> to vector<2x32xf32>
    %96 = arith.negf %95 : vector<2x32xf32>
    %97 = math.exp %96 : vector<2x32xf32>
    %cst_20 = arith.constant 1.000000e+00 : f32
    %98 = vector.broadcast %cst_20 : f32 to vector<2x32xf32>
    %99 = arith.addf %98, %97 : vector<2x32xf32>
    %100 = arith.divf %98, %99 : vector<2x32xf32>
    %101 = arith.mulf %92, %32 : vector<2x32xf32>
    %102 = arith.mulf %86, %94 : vector<2x32xf32>
    %103 = arith.addf %101, %102 : vector<2x32xf32>
    %104 = math.tanh %103 : vector<2x32xf32>
    %105 = arith.mulf %100, %104 : vector<2x32xf32>
    %106 = arith.index_cast %c1_i32 : i32 to index
    %c0_21 = arith.constant 0 : index
    %c0_22 = arith.constant 0 : index
    %107 = vector.load %arg3[%106, %c0_21, %c0_22] : memref<8x2x64xf32, #tpu.memory_space<vmem>>, vector<1x2x32xf32>
    %108 = vector.shape_cast %107 : vector<1x2x32xf32> to vector<2x32xf32>
    %109 = vector.shape_cast %105 : vector<2x32xf32> to vector<1x2x32xf32>
    tpu.vector_store %arg3[%106, %c0_21, %c0_22], %109 {strides = array<i32>} : memref<8x2x64xf32, #tpu.memory_space<vmem>>, vector<1x2x32xf32>,
    %c7_i32_23 = arith.constant 7 : i32
    %110 = arith.subi %c7_i32_23, %c1_i32 : i32
    %111 = arith.index_cast %110 : i32 to index
    %c0_24 = arith.constant 0 : index
    %c128_25 = arith.constant 128 : index
    %112 = vector.load %arg1[%111, %c0_24, %c128_25] : memref<8x2x256xf32, #tpu.memory_space<vmem>>, vector<1x2x128xf32>
    %113 = vector.shape_cast %112 : vector<1x2x128xf32> to vector<2x128xf32>
    %114 = arith.truncf %70 : vector<2x32xf32> to vector<2x32xbf16>
    %cst_26 = arith.constant dense<0.000000e+00> : vector<2x128xf32>
    %115 = tpu.matmul %114, %2, %cst_26 {dimension_numbers = #tpu.dot_dimension_numbers<[1], [0], [0], [1], [0, 0, 1, 1], [], []>} : vector<2x32xbf16>, vector<32x128xbf16>, vector<2x128xf32> -> vector<2x128xf32>
    %116 = arith.addf %113, %115 : vector<2x128xf32>
    %117 = vector.extract_strided_slice %116 {offsets = [0, 0], sizes = [2, 32], strides = [1, 1]} : vector<2x128xf32> to vector<2x32xf32>
    %118 = arith.negf %117 : vector<2x32xf32>
    %119 = math.exp %118 : vector<2x32xf32>
    %cst_27 = arith.constant 1.000000e+00 : f32
    %120 = vector.broadcast %cst_27 : f32 to vector<2x32xf32>
    %121 = arith.addf %120, %119 : vector<2x32xf32>
    %122 = arith.divf %120, %121 : vector<2x32xf32>
    %123 = vector.extract_strided_slice %116 {offsets = [0, 32], sizes = [2, 32], strides = [1, 1]} : vector<2x128xf32> to vector<2x32xf32>
    %124 = arith.negf %123 : vector<2x32xf32>
    %125 = math.exp %124 : vector<2x32xf32>
    %cst_28 = arith.constant 1.000000e+00 : f32
    %126 = vector.broadcast %cst_28 : f32 to vector<2x32xf32>
    %127 = arith.addf %126, %125 : vector<2x32xf32>
    %128 = arith.divf %126, %127 : vector<2x32xf32>
    %129 = vector.extract_strided_slice %116 {offsets = [0, 64], sizes = [2, 32], strides = [1, 1]} : vector<2x128xf32> to vector<2x32xf32>
    %130 = math.tanh %129 : vector<2x32xf32>
    %131 = vector.extract_strided_slice %116 {offsets = [0, 96], sizes = [2, 32], strides = [1, 1]} : vector<2x128xf32> to vector<2x32xf32>
    %132 = arith.negf %131 : vector<2x32xf32>
    %133 = math.exp %132 : vector<2x32xf32>
    %cst_29 = arith.constant 1.000000e+00 : f32
    %134 = vector.broadcast %cst_29 : f32 to vector<2x32xf32>
    %135 = arith.addf %134, %133 : vector<2x32xf32>
    %136 = arith.divf %134, %135 : vector<2x32xf32>
    %137 = arith.mulf %128, %68 : vector<2x32xf32>
    %138 = arith.mulf %122, %130 : vector<2x32xf32>
    %139 = arith.addf %137, %138 : vector<2x32xf32>
    %140 = math.tanh %139 : vector<2x32xf32>
    %141 = arith.mulf %136, %140 : vector<2x32xf32>
    %142 = arith.index_cast %110 : i32 to index
    %c0_30 = arith.constant 0 : index
    %c32_31 = arith.constant 32 : index
    %143 = vector.load %arg3[%142, %c0_30, %c32_31] : memref<8x2x64xf32, #tpu.memory_space<vmem>>, vector<1x2x32xf32>
    %144 = vector.shape_cast %143 : vector<1x2x32xf32> to vector<2x32xf32>
    %145 = vector.shape_cast %141 : vector<2x32xf32> to vector<1x2x32xf32>
    tpu.vector_store %arg3[%142, %c0_30, %c32_31], %145 {strides = array<i32>} : memref<8x2x64xf32, #tpu.memory_space<vmem>>, vector<1x2x32xf32>,
    %c2_i32 = arith.constant 2 : i32
    %146 = arith.index_cast %c2_i32 : i32 to index
    %c0_32 = arith.constant 0 : index
    %c0_33 = arith.constant 0 : index
    %147 = vector.load %arg1[%146, %c0_32, %c0_33] : memref<8x2x256xf32, #tpu.memory_space<vmem>>, vector<1x2x128xf32>
    %148 = vector.shape_cast %147 : vector<1x2x128xf32> to vector<2x128xf32>
    %149 = arith.truncf %105 : vector<2x32xf32> to vector<2x32xbf16>
    %cst_34 = arith.constant dense<0.000000e+00> : vector<2x128xf32>
    %150 = tpu.matmul %149, %1, %cst_34 {dimension_numbers = #tpu.dot_dimension_numbers<[1], [0], [0], [1], [0, 0, 1, 1], [], []>} : vector<2x32xbf16>, vector<32x128xbf16>, vector<2x128xf32> -> vector<2x128xf32>
    %151 = arith.addf %148, %150 : vector<2x128xf32>
    %152 = vector.extract_strided_slice %151 {offsets = [0, 0], sizes = [2, 32], strides = [1, 1]} : vector<2x128xf32> to vector<2x32xf32>
    %153 = arith.negf %152 : vector<2x32xf32>
    %154 = math.exp %153 : vector<2x32xf32>
    %cst_35 = arith.constant 1.000000e+00 : f32
    %155 = vector.broadcast %cst_35 : f32 to vector<2x32xf32>
    %156 = arith.addf %155, %154 : vector<2x32xf32>
    %157 = arith.divf %155, %156 : vector<2x32xf32>
    %158 = vector.extract_strided_slice %151 {offsets = [0, 32], sizes = [2, 32], strides = [1, 1]} : vector<2x128xf32> to vector<2x32xf32>
    %159 = arith.negf %158 : vector<2x32xf32>
    %160 = math.exp %159 : vector<2x32xf32>
    %cst_36 = arith.constant 1.000000e+00 : f32
    %161 = vector.broadcast %cst_36 : f32 to vector<2x32xf32>
    %162 = arith.addf %161, %160 : vector<2x32xf32>
    %163 = arith.divf %161, %162 : vector<2x32xf32>
    %164 = vector.extract_strided_slice %151 {offsets = [0, 64], sizes = [2, 32], strides = [1, 1]} : vector<2x128xf32> to vector<2x32xf32>
    %165 = math.tanh %164 : vector<2x32xf32>
    %166 = vector.extract_strided_slice %151 {offsets = [0, 96], sizes = [2, 32], strides = [1, 1]} : vector<2x128xf32> to vector<2x32xf32>
    %167 = arith.negf %166 : vector<2x32xf32>
    %168 = math.exp %167 : vector<2x32xf32>
    %cst_37 = arith.constant 1.000000e+00 : f32
    %169 = vector.broadcast %cst_37 : f32 to vector<2x32xf32>
    %170 = arith.addf %169, %168 : vector<2x32xf32>
    %171 = arith.divf %169, %170 : vector<2x32xf32>
    %172 = arith.mulf %163, %103 : vector<2x32xf32>
    %173 = arith.mulf %157, %165 : vector<2x32xf32>
    %174 = arith.addf %172, %173 : vector<2x32xf32>
    %175 = math.tanh %174 : vector<2x32xf32>
    %176 = arith.mulf %171, %175 : vector<2x32xf32>
    %177 = arith.index_cast %c2_i32 : i32 to index
    %c0_38 = arith.constant 0 : index
    %c0_39 = arith.constant 0 : index
    %178 = vector.load %arg3[%177, %c0_38, %c0_39] : memref<8x2x64xf32, #tpu.memory_space<vmem>>, vector<1x2x32xf32>
    %179 = vector.shape_cast %178 : vector<1x2x32xf32> to vector<2x32xf32>
    %180 = vector.shape_cast %176 : vector<2x32xf32> to vector<1x2x32xf32>
    tpu.vector_store %arg3[%177, %c0_38, %c0_39], %180 {strides = array<i32>} : memref<8x2x64xf32, #tpu.memory_space<vmem>>, vector<1x2x32xf32>,
    %c7_i32_40 = arith.constant 7 : i32
    %181 = arith.subi %c7_i32_40, %c2_i32 : i32
    %182 = arith.index_cast %181 : i32 to index
    %c0_41 = arith.constant 0 : index
    %c128_42 = arith.constant 128 : index
    %183 = vector.load %arg1[%182, %c0_41, %c128_42] : memref<8x2x256xf32, #tpu.memory_space<vmem>>, vector<1x2x128xf32>
    %184 = vector.shape_cast %183 : vector<1x2x128xf32> to vector<2x128xf32>
    %185 = arith.truncf %141 : vector<2x32xf32> to vector<2x32xbf16>
    %cst_43 = arith.constant dense<0.000000e+00> : vector<2x128xf32>
    %186 = tpu.matmul %185, %2, %cst_43 {dimension_numbers = #tpu.dot_dimension_numbers<[1], [0], [0], [1], [0, 0, 1, 1], [], []>} : vector<2x32xbf16>, vector<32x128xbf16>, vector<2x128xf32> -> vector<2x128xf32>
    %187 = arith.addf %184, %186 : vector<2x128xf32>
    %188 = vector.extract_strided_slice %187 {offsets = [0, 0], sizes = [2, 32], strides = [1, 1]} : vector<2x128xf32> to vector<2x32xf32>
    %189 = arith.negf %188 : vector<2x32xf32>
    %190 = math.exp %189 : vector<2x32xf32>
    %cst_44 = arith.constant 1.000000e+00 : f32
    %191 = vector.broadcast %cst_44 : f32 to vector<2x32xf32>
    %192 = arith.addf %191, %190 : vector<2x32xf32>
    %193 = arith.divf %191, %192 : vector<2x32xf32>
    %194 = vector.extract_strided_slice %187 {offsets = [0, 32], sizes = [2, 32], strides = [1, 1]} : vector<2x128xf32> to vector<2x32xf32>
    %195 = arith.negf %194 : vector<2x32xf32>
    %196 = math.exp %195 : vector<2x32xf32>
    %cst_45 = arith.constant 1.000000e+00 : f32
    %197 = vector.broadcast %cst_45 : f32 to vector<2x32xf32>
    %198 = arith.addf %197, %196 : vector<2x32xf32>
    %199 = arith.divf %197, %198 : vector<2x32xf32>
    %200 = vector.extract_strided_slice %187 {offsets = [0, 64], sizes = [2, 32], strides = [1, 1]} : vector<2x128xf32> to vector<2x32xf32>
    %201 = math.tanh %200 : vector<2x32xf32>
    %202 = vector.extract_strided_slice %187 {offsets = [0, 96], sizes = [2, 32], strides = [1, 1]} : vector<2x128xf32> to vector<2x32xf32>
    %203 = arith.negf %202 : vector<2x32xf32>
    %204 = math.exp %203 : vector<2x32xf32>
    %cst_46 = arith.constant 1.000000e+00 : f32
    %205 = vector.broadcast %cst_46 : f32 to vector<2x32xf32>
    %206 = arith.addf %205, %204 : vector<2x32xf32>
    %207 = arith.divf %205, %206 : vector<2x32xf32>
    %208 = arith.mulf %199, %139 : vector<2x32xf32>
    %209 = arith.mulf %193, %201 : vector<2x32xf32>
    %210 = arith.addf %208, %209 : vector<2x32xf32>
    %211 = math.tanh %210 : vector<2x32xf32>
    %212 = arith.mulf %207, %211 : vector<2x32xf32>
    %213 = arith.index_cast %181 : i32 to index
    %c0_47 = arith.constant 0 : index
    %c32_48 = arith.constant 32 : index
    %214 = vector.load %arg3[%213, %c0_47, %c32_48] : memref<8x2x64xf32, #tpu.memory_space<vmem>>, vector<1x2x32xf32>
    %215 = vector.shape_cast %214 : vector<1x2x32xf32> to vector<2x32xf32>
    %216 = vector.shape_cast %212 : vector<2x32xf32> to vector<1x2x32xf32>
    tpu.vector_store %arg3[%213, %c0_47, %c32_48], %216 {strides = array<i32>} : memref<8x2x64xf32, #tpu.memory_space<vmem>>, vector<1x2x32xf32>,
    %c3_i32 = arith.constant 3 : i32
    %217 = arith.index_cast %c3_i32 : i32 to index
    %c0_49 = arith.constant 0 : index
    %c0_50 = arith.constant 0 : index
    %218 = vector.load %arg1[%217, %c0_49, %c0_50] : memref<8x2x256xf32, #tpu.memory_space<vmem>>, vector<1x2x128xf32>
    %219 = vector.shape_cast %218 : vector<1x2x128xf32> to vector<2x128xf32>
    %220 = arith.truncf %176 : vector<2x32xf32> to vector<2x32xbf16>
    %cst_51 = arith.constant dense<0.000000e+00> : vector<2x128xf32>
    %221 = tpu.matmul %220, %1, %cst_51 {dimension_numbers = #tpu.dot_dimension_numbers<[1], [0], [0], [1], [0, 0, 1, 1], [], []>} : vector<2x32xbf16>, vector<32x128xbf16>, vector<2x128xf32> -> vector<2x128xf32>
    %222 = arith.addf %219, %221 : vector<2x128xf32>
    %223 = vector.extract_strided_slice %222 {offsets = [0, 0], sizes = [2, 32], strides = [1, 1]} : vector<2x128xf32> to vector<2x32xf32>
    %224 = arith.negf %223 : vector<2x32xf32>
    %225 = math.exp %224 : vector<2x32xf32>
    %cst_52 = arith.constant 1.000000e+00 : f32
    %226 = vector.broadcast %cst_52 : f32 to vector<2x32xf32>
    %227 = arith.addf %226, %225 : vector<2x32xf32>
    %228 = arith.divf %226, %227 : vector<2x32xf32>
    %229 = vector.extract_strided_slice %222 {offsets = [0, 32], sizes = [2, 32], strides = [1, 1]} : vector<2x128xf32> to vector<2x32xf32>
    %230 = arith.negf %229 : vector<2x32xf32>
    %231 = math.exp %230 : vector<2x32xf32>
    %cst_53 = arith.constant 1.000000e+00 : f32
    %232 = vector.broadcast %cst_53 : f32 to vector<2x32xf32>
    %233 = arith.addf %232, %231 : vector<2x32xf32>
    %234 = arith.divf %232, %233 : vector<2x32xf32>
    %235 = vector.extract_strided_slice %222 {offsets = [0, 64], sizes = [2, 32], strides = [1, 1]} : vector<2x128xf32> to vector<2x32xf32>
    %236 = math.tanh %235 : vector<2x32xf32>
    %237 = vector.extract_strided_slice %222 {offsets = [0, 96], sizes = [2, 32], strides = [1, 1]} : vector<2x128xf32> to vector<2x32xf32>
    %238 = arith.negf %237 : vector<2x32xf32>
    %239 = math.exp %238 : vector<2x32xf32>
    %cst_54 = arith.constant 1.000000e+00 : f32
    %240 = vector.broadcast %cst_54 : f32 to vector<2x32xf32>
    %241 = arith.addf %240, %239 : vector<2x32xf32>
    %242 = arith.divf %240, %241 : vector<2x32xf32>
    %243 = arith.mulf %234, %174 : vector<2x32xf32>
    %244 = arith.mulf %228, %236 : vector<2x32xf32>
    %245 = arith.addf %243, %244 : vector<2x32xf32>
    %246 = math.tanh %245 : vector<2x32xf32>
    %247 = arith.mulf %242, %246 : vector<2x32xf32>
    %248 = arith.index_cast %c3_i32 : i32 to index
    %c0_55 = arith.constant 0 : index
    %c0_56 = arith.constant 0 : index
    %249 = vector.load %arg3[%248, %c0_55, %c0_56] : memref<8x2x64xf32, #tpu.memory_space<vmem>>, vector<1x2x32xf32>
    %250 = vector.shape_cast %249 : vector<1x2x32xf32> to vector<2x32xf32>
    %251 = vector.shape_cast %247 : vector<2x32xf32> to vector<1x2x32xf32>
    tpu.vector_store %arg3[%248, %c0_55, %c0_56], %251 {strides = array<i32>} : memref<8x2x64xf32, #tpu.memory_space<vmem>>, vector<1x2x32xf32>,
    %c7_i32_57 = arith.constant 7 : i32
    %252 = arith.subi %c7_i32_57, %c3_i32 : i32
    %253 = arith.index_cast %252 : i32 to index
    %c0_58 = arith.constant 0 : index
    %c128_59 = arith.constant 128 : index
    %254 = vector.load %arg1[%253, %c0_58, %c128_59] : memref<8x2x256xf32, #tpu.memory_space<vmem>>, vector<1x2x128xf32>
    %255 = vector.shape_cast %254 : vector<1x2x128xf32> to vector<2x128xf32>
    %256 = arith.truncf %212 : vector<2x32xf32> to vector<2x32xbf16>
    %cst_60 = arith.constant dense<0.000000e+00> : vector<2x128xf32>
    %257 = tpu.matmul %256, %2, %cst_60 {dimension_numbers = #tpu.dot_dimension_numbers<[1], [0], [0], [1], [0, 0, 1, 1], [], []>} : vector<2x32xbf16>, vector<32x128xbf16>, vector<2x128xf32> -> vector<2x128xf32>
    %258 = arith.addf %255, %257 : vector<2x128xf32>
    %259 = vector.extract_strided_slice %258 {offsets = [0, 0], sizes = [2, 32], strides = [1, 1]} : vector<2x128xf32> to vector<2x32xf32>
    %260 = arith.negf %259 : vector<2x32xf32>
    %261 = math.exp %260 : vector<2x32xf32>
    %cst_61 = arith.constant 1.000000e+00 : f32
    %262 = vector.broadcast %cst_61 : f32 to vector<2x32xf32>
    %263 = arith.addf %262, %261 : vector<2x32xf32>
    %264 = arith.divf %262, %263 : vector<2x32xf32>
    %265 = vector.extract_strided_slice %258 {offsets = [0, 32], sizes = [2, 32], strides = [1, 1]} : vector<2x128xf32> to vector<2x32xf32>
    %266 = arith.negf %265 : vector<2x32xf32>
    %267 = math.exp %266 : vector<2x32xf32>
    %cst_62 = arith.constant 1.000000e+00 : f32
    %268 = vector.broadcast %cst_62 : f32 to vector<2x32xf32>
    %269 = arith.addf %268, %267 : vector<2x32xf32>
    %270 = arith.divf %268, %269 : vector<2x32xf32>
    %271 = vector.extract_strided_slice %258 {offsets = [0, 64], sizes = [2, 32], strides = [1, 1]} : vector<2x128xf32> to vector<2x32xf32>
    %272 = math.tanh %271 : vector<2x32xf32>
    %273 = vector.extract_strided_slice %258 {offsets = [0, 96], sizes = [2, 32], strides = [1, 1]} : vector<2x128xf32> to vector<2x32xf32>
    %274 = arith.negf %273 : vector<2x32xf32>
    %275 = math.exp %274 : vector<2x32xf32>
    %cst_63 = arith.constant 1.000000e+00 : f32
    %276 = vector.broadcast %cst_63 : f32 to vector<2x32xf32>
    %277 = arith.addf %276, %275 : vector<2x32xf32>
    %278 = arith.divf %276, %277 : vector<2x32xf32>
    %279 = arith.mulf %270, %210 : vector<2x32xf32>
    %280 = arith.mulf %264, %272 : vector<2x32xf32>
    %281 = arith.addf %279, %280 : vector<2x32xf32>
    %282 = math.tanh %281 : vector<2x32xf32>
    %283 = arith.mulf %278, %282 : vector<2x32xf32>
    %284 = arith.index_cast %252 : i32 to index
    %c0_64 = arith.constant 0 : index
    %c32_65 = arith.constant 32 : index
    %285 = vector.load %arg3[%284, %c0_64, %c32_65] : memref<8x2x64xf32, #tpu.memory_space<vmem>>, vector<1x2x32xf32>
    %286 = vector.shape_cast %285 : vector<1x2x32xf32> to vector<2x32xf32>
    %287 = vector.shape_cast %283 : vector<2x32xf32> to vector<1x2x32xf32>
    tpu.vector_store %arg3[%284, %c0_64, %c32_65], %287 {strides = array<i32>} : memref<8x2x64xf32, #tpu.memory_space<vmem>>, vector<1x2x32xf32>,
    %c4_i32 = arith.constant 4 : i32
    %288 = arith.index_cast %c4_i32 : i32 to index
    %c0_66 = arith.constant 0 : index
    %c0_67 = arith.constant 0 : index
    %289 = vector.load %arg1[%288, %c0_66, %c0_67] : memref<8x2x256xf32, #tpu.memory_space<vmem>>, vector<1x2x128xf32>
    %290 = vector.shape_cast %289 : vector<1x2x128xf32> to vector<2x128xf32>
    %291 = arith.truncf %247 : vector<2x32xf32> to vector<2x32xbf16>
    %cst_68 = arith.constant dense<0.000000e+00> : vector<2x128xf32>
    %292 = tpu.matmul %291, %1, %cst_68 {dimension_numbers = #tpu.dot_dimension_numbers<[1], [0], [0], [1], [0, 0, 1, 1], [], []>} : vector<2x32xbf16>, vector<32x128xbf16>, vector<2x128xf32> -> vector<2x128xf32>
    %293 = arith.addf %290, %292 : vector<2x128xf32>
    %294 = vector.extract_strided_slice %293 {offsets = [0, 0], sizes = [2, 32], strides = [1, 1]} : vector<2x128xf32> to vector<2x32xf32>
    %295 = arith.negf %294 : vector<2x32xf32>
    %296 = math.exp %295 : vector<2x32xf32>
    %cst_69 = arith.constant 1.000000e+00 : f32
    %297 = vector.broadcast %cst_69 : f32 to vector<2x32xf32>
    %298 = arith.addf %297, %296 : vector<2x32xf32>
    %299 = arith.divf %297, %298 : vector<2x32xf32>
    %300 = vector.extract_strided_slice %293 {offsets = [0, 32], sizes = [2, 32], strides = [1, 1]} : vector<2x128xf32> to vector<2x32xf32>
    %301 = arith.negf %300 : vector<2x32xf32>
    %302 = math.exp %301 : vector<2x32xf32>
    %cst_70 = arith.constant 1.000000e+00 : f32
    %303 = vector.broadcast %cst_70 : f32 to vector<2x32xf32>
    %304 = arith.addf %303, %302 : vector<2x32xf32>
    %305 = arith.divf %303, %304 : vector<2x32xf32>
    %306 = vector.extract_strided_slice %293 {offsets = [0, 64], sizes = [2, 32], strides = [1, 1]} : vector<2x128xf32> to vector<2x32xf32>
    %307 = math.tanh %306 : vector<2x32xf32>
    %308 = vector.extract_strided_slice %293 {offsets = [0, 96], sizes = [2, 32], strides = [1, 1]} : vector<2x128xf32> to vector<2x32xf32>
    %309 = arith.negf %308 : vector<2x32xf32>
    %310 = math.exp %309 : vector<2x32xf32>
    %cst_71 = arith.constant 1.000000e+00 : f32
    %311 = vector.broadcast %cst_71 : f32 to vector<2x32xf32>
    %312 = arith.addf %311, %310 : vector<2x32xf32>
    %313 = arith.divf %311, %312 : vector<2x32xf32>
    %314 = arith.mulf %305, %245 : vector<2x32xf32>
    %315 = arith.mulf %299, %307 : vector<2x32xf32>
    %316 = arith.addf %314, %315 : vector<2x32xf32>
    %317 = math.tanh %316 : vector<2x32xf32>
    %318 = arith.mulf %313, %317 : vector<2x32xf32>
    %319 = arith.index_cast %c4_i32 : i32 to index
    %c0_72 = arith.constant 0 : index
    %c0_73 = arith.constant 0 : index
    %320 = vector.load %arg3[%319, %c0_72, %c0_73] : memref<8x2x64xf32, #tpu.memory_space<vmem>>, vector<1x2x32xf32>
    %321 = vector.shape_cast %320 : vector<1x2x32xf32> to vector<2x32xf32>
    %322 = vector.shape_cast %318 : vector<2x32xf32> to vector<1x2x32xf32>
    tpu.vector_store %arg3[%319, %c0_72, %c0_73], %322 {strides = array<i32>} : memref<8x2x64xf32, #tpu.memory_space<vmem>>, vector<1x2x32xf32>,
    %c7_i32_74 = arith.constant 7 : i32
    %323 = arith.subi %c7_i32_74, %c4_i32 : i32
    %324 = arith.index_cast %323 : i32 to index
    %c0_75 = arith.constant 0 : index
    %c128_76 = arith.constant 128 : index
    %325 = vector.load %arg1[%324, %c0_75, %c128_76] : memref<8x2x256xf32, #tpu.memory_space<vmem>>, vector<1x2x128xf32>
    %326 = vector.shape_cast %325 : vector<1x2x128xf32> to vector<2x128xf32>
    %327 = arith.truncf %283 : vector<2x32xf32> to vector<2x32xbf16>
    %cst_77 = arith.constant dense<0.000000e+00> : vector<2x128xf32>
    %328 = tpu.matmul %327, %2, %cst_77 {dimension_numbers = #tpu.dot_dimension_numbers<[1], [0], [0], [1], [0, 0, 1, 1], [], []>} : vector<2x32xbf16>, vector<32x128xbf16>, vector<2x128xf32> -> vector<2x128xf32>
    %329 = arith.addf %326, %328 : vector<2x128xf32>
    %330 = vector.extract_strided_slice %329 {offsets = [0, 0], sizes = [2, 32], strides = [1, 1]} : vector<2x128xf32> to vector<2x32xf32>
    %331 = arith.negf %330 : vector<2x32xf32>
    %332 = math.exp %331 : vector<2x32xf32>
    %cst_78 = arith.constant 1.000000e+00 : f32
    %333 = vector.broadcast %cst_78 : f32 to vector<2x32xf32>
    %334 = arith.addf %333, %332 : vector<2x32xf32>
    %335 = arith.divf %333, %334 : vector<2x32xf32>
    %336 = vector.extract_strided_slice %329 {offsets = [0, 32], sizes = [2, 32], strides = [1, 1]} : vector<2x128xf32> to vector<2x32xf32>
    %337 = arith.negf %336 : vector<2x32xf32>
    %338 = math.exp %337 : vector<2x32xf32>
    %cst_79 = arith.constant 1.000000e+00 : f32
    %339 = vector.broadcast %cst_79 : f32 to vector<2x32xf32>
    %340 = arith.addf %339, %338 : vector<2x32xf32>
    %341 = arith.divf %339, %340 : vector<2x32xf32>
    %342 = vector.extract_strided_slice %329 {offsets = [0, 64], sizes = [2, 32], strides = [1, 1]} : vector<2x128xf32> to vector<2x32xf32>
    %343 = math.tanh %342 : vector<2x32xf32>
    %344 = vector.extract_strided_slice %329 {offsets = [0, 96], sizes = [2, 32], strides = [1, 1]} : vector<2x128xf32> to vector<2x32xf32>
    %345 = arith.negf %344 : vector<2x32xf32>
    %346 = math.exp %345 : vector<2x32xf32>
    %cst_80 = arith.constant 1.000000e+00 : f32
    %347 = vector.broadcast %cst_80 : f32 to vector<2x32xf32>
    %348 = arith.addf %347, %346 : vector<2x32xf32>
    %349 = arith.divf %347, %348 : vector<2x32xf32>
    %350 = arith.mulf %341, %281 : vector<2x32xf32>
    %351 = arith.mulf %335, %343 : vector<2x32xf32>
    %352 = arith.addf %350, %351 : vector<2x32xf32>
    %353 = math.tanh %352 : vector<2x32xf32>
    %354 = arith.mulf %349, %353 : vector<2x32xf32>
    %355 = arith.index_cast %323 : i32 to index
    %c0_81 = arith.constant 0 : index
    %c32_82 = arith.constant 32 : index
    %356 = vector.load %arg3[%355, %c0_81, %c32_82] : memref<8x2x64xf32, #tpu.memory_space<vmem>>, vector<1x2x32xf32>
    %357 = vector.shape_cast %356 : vector<1x2x32xf32> to vector<2x32xf32>
    %358 = vector.shape_cast %354 : vector<2x32xf32> to vector<1x2x32xf32>
    tpu.vector_store %arg3[%355, %c0_81, %c32_82], %358 {strides = array<i32>} : memref<8x2x64xf32, #tpu.memory_space<vmem>>, vector<1x2x32xf32>,
    %c5_i32 = arith.constant 5 : i32
    %359 = arith.index_cast %c5_i32 : i32 to index
    %c0_83 = arith.constant 0 : index
    %c0_84 = arith.constant 0 : index
    %360 = vector.load %arg1[%359, %c0_83, %c0_84] : memref<8x2x256xf32, #tpu.memory_space<vmem>>, vector<1x2x128xf32>
    %361 = vector.shape_cast %360 : vector<1x2x128xf32> to vector<2x128xf32>
    %362 = arith.truncf %318 : vector<2x32xf32> to vector<2x32xbf16>
    %cst_85 = arith.constant dense<0.000000e+00> : vector<2x128xf32>
    %363 = tpu.matmul %362, %1, %cst_85 {dimension_numbers = #tpu.dot_dimension_numbers<[1], [0], [0], [1], [0, 0, 1, 1], [], []>} : vector<2x32xbf16>, vector<32x128xbf16>, vector<2x128xf32> -> vector<2x128xf32>
    %364 = arith.addf %361, %363 : vector<2x128xf32>
    %365 = vector.extract_strided_slice %364 {offsets = [0, 0], sizes = [2, 32], strides = [1, 1]} : vector<2x128xf32> to vector<2x32xf32>
    %366 = arith.negf %365 : vector<2x32xf32>
    %367 = math.exp %366 : vector<2x32xf32>
    %cst_86 = arith.constant 1.000000e+00 : f32
    %368 = vector.broadcast %cst_86 : f32 to vector<2x32xf32>
    %369 = arith.addf %368, %367 : vector<2x32xf32>
    %370 = arith.divf %368, %369 : vector<2x32xf32>
    %371 = vector.extract_strided_slice %364 {offsets = [0, 32], sizes = [2, 32], strides = [1, 1]} : vector<2x128xf32> to vector<2x32xf32>
    %372 = arith.negf %371 : vector<2x32xf32>
    %373 = math.exp %372 : vector<2x32xf32>
    %cst_87 = arith.constant 1.000000e+00 : f32
    %374 = vector.broadcast %cst_87 : f32 to vector<2x32xf32>
    %375 = arith.addf %374, %373 : vector<2x32xf32>
    %376 = arith.divf %374, %375 : vector<2x32xf32>
    %377 = vector.extract_strided_slice %364 {offsets = [0, 64], sizes = [2, 32], strides = [1, 1]} : vector<2x128xf32> to vector<2x32xf32>
    %378 = math.tanh %377 : vector<2x32xf32>
    %379 = vector.extract_strided_slice %364 {offsets = [0, 96], sizes = [2, 32], strides = [1, 1]} : vector<2x128xf32> to vector<2x32xf32>
    %380 = arith.negf %379 : vector<2x32xf32>
    %381 = math.exp %380 : vector<2x32xf32>
    %cst_88 = arith.constant 1.000000e+00 : f32
    %382 = vector.broadcast %cst_88 : f32 to vector<2x32xf32>
    %383 = arith.addf %382, %381 : vector<2x32xf32>
    %384 = arith.divf %382, %383 : vector<2x32xf32>
    %385 = arith.mulf %376, %316 : vector<2x32xf32>
    %386 = arith.mulf %370, %378 : vector<2x32xf32>
    %387 = arith.addf %385, %386 : vector<2x32xf32>
    %388 = math.tanh %387 : vector<2x32xf32>
    %389 = arith.mulf %384, %388 : vector<2x32xf32>
    %390 = arith.index_cast %c5_i32 : i32 to index
    %c0_89 = arith.constant 0 : index
    %c0_90 = arith.constant 0 : index
    %391 = vector.load %arg3[%390, %c0_89, %c0_90] : memref<8x2x64xf32, #tpu.memory_space<vmem>>, vector<1x2x32xf32>
    %392 = vector.shape_cast %391 : vector<1x2x32xf32> to vector<2x32xf32>
    %393 = vector.shape_cast %389 : vector<2x32xf32> to vector<1x2x32xf32>
    tpu.vector_store %arg3[%390, %c0_89, %c0_90], %393 {strides = array<i32>} : memref<8x2x64xf32, #tpu.memory_space<vmem>>, vector<1x2x32xf32>,
    %c7_i32_91 = arith.constant 7 : i32
    %394 = arith.subi %c7_i32_91, %c5_i32 : i32
    %395 = arith.index_cast %394 : i32 to index
    %c0_92 = arith.constant 0 : index
    %c128_93 = arith.constant 128 : index
    %396 = vector.load %arg1[%395, %c0_92, %c128_93] : memref<8x2x256xf32, #tpu.memory_space<vmem>>, vector<1x2x128xf32>
    %397 = vector.shape_cast %396 : vector<1x2x128xf32> to vector<2x128xf32>
    %398 = arith.truncf %354 : vector<2x32xf32> to vector<2x32xbf16>
    %cst_94 = arith.constant dense<0.000000e+00> : vector<2x128xf32>
    %399 = tpu.matmul %398, %2, %cst_94 {dimension_numbers = #tpu.dot_dimension_numbers<[1], [0], [0], [1], [0, 0, 1, 1], [], []>} : vector<2x32xbf16>, vector<32x128xbf16>, vector<2x128xf32> -> vector<2x128xf32>
    %400 = arith.addf %397, %399 : vector<2x128xf32>
    %401 = vector.extract_strided_slice %400 {offsets = [0, 0], sizes = [2, 32], strides = [1, 1]} : vector<2x128xf32> to vector<2x32xf32>
    %402 = arith.negf %401 : vector<2x32xf32>
    %403 = math.exp %402 : vector<2x32xf32>
    %cst_95 = arith.constant 1.000000e+00 : f32
    %404 = vector.broadcast %cst_95 : f32 to vector<2x32xf32>
    %405 = arith.addf %404, %403 : vector<2x32xf32>
    %406 = arith.divf %404, %405 : vector<2x32xf32>
    %407 = vector.extract_strided_slice %400 {offsets = [0, 32], sizes = [2, 32], strides = [1, 1]} : vector<2x128xf32> to vector<2x32xf32>
    %408 = arith.negf %407 : vector<2x32xf32>
    %409 = math.exp %408 : vector<2x32xf32>
    %cst_96 = arith.constant 1.000000e+00 : f32
    %410 = vector.broadcast %cst_96 : f32 to vector<2x32xf32>
    %411 = arith.addf %410, %409 : vector<2x32xf32>
    %412 = arith.divf %410, %411 : vector<2x32xf32>
    %413 = vector.extract_strided_slice %400 {offsets = [0, 64], sizes = [2, 32], strides = [1, 1]} : vector<2x128xf32> to vector<2x32xf32>
    %414 = math.tanh %413 : vector<2x32xf32>
    %415 = vector.extract_strided_slice %400 {offsets = [0, 96], sizes = [2, 32], strides = [1, 1]} : vector<2x128xf32> to vector<2x32xf32>
    %416 = arith.negf %415 : vector<2x32xf32>
    %417 = math.exp %416 : vector<2x32xf32>
    %cst_97 = arith.constant 1.000000e+00 : f32
    %418 = vector.broadcast %cst_97 : f32 to vector<2x32xf32>
    %419 = arith.addf %418, %417 : vector<2x32xf32>
    %420 = arith.divf %418, %419 : vector<2x32xf32>
    %421 = arith.mulf %412, %352 : vector<2x32xf32>
    %422 = arith.mulf %406, %414 : vector<2x32xf32>
    %423 = arith.addf %421, %422 : vector<2x32xf32>
    %424 = math.tanh %423 : vector<2x32xf32>
    %425 = arith.mulf %420, %424 : vector<2x32xf32>
    %426 = arith.index_cast %394 : i32 to index
    %c0_98 = arith.constant 0 : index
    %c32_99 = arith.constant 32 : index
    %427 = vector.load %arg3[%426, %c0_98, %c32_99] : memref<8x2x64xf32, #tpu.memory_space<vmem>>, vector<1x2x32xf32>
    %428 = vector.shape_cast %427 : vector<1x2x32xf32> to vector<2x32xf32>
    %429 = vector.shape_cast %425 : vector<2x32xf32> to vector<1x2x32xf32>
    tpu.vector_store %arg3[%426, %c0_98, %c32_99], %429 {strides = array<i32>} : memref<8x2x64xf32, #tpu.memory_space<vmem>>, vector<1x2x32xf32>,
    %c6_i32 = arith.constant 6 : i32
    %430 = arith.index_cast %c6_i32 : i32 to index
    %c0_100 = arith.constant 0 : index
    %c0_101 = arith.constant 0 : index
    %431 = vector.load %arg1[%430, %c0_100, %c0_101] : memref<8x2x256xf32, #tpu.memory_space<vmem>>, vector<1x2x128xf32>
    %432 = vector.shape_cast %431 : vector<1x2x128xf32> to vector<2x128xf32>
    %433 = arith.truncf %389 : vector<2x32xf32> to vector<2x32xbf16>
    %cst_102 = arith.constant dense<0.000000e+00> : vector<2x128xf32>
    %434 = tpu.matmul %433, %1, %cst_102 {dimension_numbers = #tpu.dot_dimension_numbers<[1], [0], [0], [1], [0, 0, 1, 1], [], []>} : vector<2x32xbf16>, vector<32x128xbf16>, vector<2x128xf32> -> vector<2x128xf32>
    %435 = arith.addf %432, %434 : vector<2x128xf32>
    %436 = vector.extract_strided_slice %435 {offsets = [0, 0], sizes = [2, 32], strides = [1, 1]} : vector<2x128xf32> to vector<2x32xf32>
    %437 = arith.negf %436 : vector<2x32xf32>
    %438 = math.exp %437 : vector<2x32xf32>
    %cst_103 = arith.constant 1.000000e+00 : f32
    %439 = vector.broadcast %cst_103 : f32 to vector<2x32xf32>
    %440 = arith.addf %439, %438 : vector<2x32xf32>
    %441 = arith.divf %439, %440 : vector<2x32xf32>
    %442 = vector.extract_strided_slice %435 {offsets = [0, 32], sizes = [2, 32], strides = [1, 1]} : vector<2x128xf32> to vector<2x32xf32>
    %443 = arith.negf %442 : vector<2x32xf32>
    %444 = math.exp %443 : vector<2x32xf32>
    %cst_104 = arith.constant 1.000000e+00 : f32
    %445 = vector.broadcast %cst_104 : f32 to vector<2x32xf32>
    %446 = arith.addf %445, %444 : vector<2x32xf32>
    %447 = arith.divf %445, %446 : vector<2x32xf32>
    %448 = vector.extract_strided_slice %435 {offsets = [0, 64], sizes = [2, 32], strides = [1, 1]} : vector<2x128xf32> to vector<2x32xf32>
    %449 = math.tanh %448 : vector<2x32xf32>
    %450 = vector.extract_strided_slice %435 {offsets = [0, 96], sizes = [2, 32], strides = [1, 1]} : vector<2x128xf32> to vector<2x32xf32>
    %451 = arith.negf %450 : vector<2x32xf32>
    %452 = math.exp %451 : vector<2x32xf32>
    %cst_105 = arith.constant 1.000000e+00 : f32
    %453 = vector.broadcast %cst_105 : f32 to vector<2x32xf32>
    %454 = arith.addf %453, %452 : vector<2x32xf32>
    %455 = arith.divf %453, %454 : vector<2x32xf32>
    %456 = arith.mulf %447, %387 : vector<2x32xf32>
    %457 = arith.mulf %441, %449 : vector<2x32xf32>
    %458 = arith.addf %456, %457 : vector<2x32xf32>
    %459 = math.tanh %458 : vector<2x32xf32>
    %460 = arith.mulf %455, %459 : vector<2x32xf32>
    %461 = arith.index_cast %c6_i32 : i32 to index
    %c0_106 = arith.constant 0 : index
    %c0_107 = arith.constant 0 : index
    %462 = vector.load %arg3[%461, %c0_106, %c0_107] : memref<8x2x64xf32, #tpu.memory_space<vmem>>, vector<1x2x32xf32>
    %463 = vector.shape_cast %462 : vector<1x2x32xf32> to vector<2x32xf32>
    %464 = vector.shape_cast %460 : vector<2x32xf32> to vector<1x2x32xf32>
    tpu.vector_store %arg3[%461, %c0_106, %c0_107], %464 {strides = array<i32>} : memref<8x2x64xf32, #tpu.memory_space<vmem>>, vector<1x2x32xf32>,
    %c7_i32_108 = arith.constant 7 : i32
    %465 = arith.subi %c7_i32_108, %c6_i32 : i32
    %466 = arith.index_cast %465 : i32 to index
    %c0_109 = arith.constant 0 : index
    %c128_110 = arith.constant 128 : index
    %467 = vector.load %arg1[%466, %c0_109, %c128_110] : memref<8x2x256xf32, #tpu.memory_space<vmem>>, vector<1x2x128xf32>
    %468 = vector.shape_cast %467 : vector<1x2x128xf32> to vector<2x128xf32>
    %469 = arith.truncf %425 : vector<2x32xf32> to vector<2x32xbf16>
    %cst_111 = arith.constant dense<0.000000e+00> : vector<2x128xf32>
    %470 = tpu.matmul %469, %2, %cst_111 {dimension_numbers = #tpu.dot_dimension_numbers<[1], [0], [0], [1], [0, 0, 1, 1], [], []>} : vector<2x32xbf16>, vector<32x128xbf16>, vector<2x128xf32> -> vector<2x128xf32>
    %471 = arith.addf %468, %470 : vector<2x128xf32>
    %472 = vector.extract_strided_slice %471 {offsets = [0, 0], sizes = [2, 32], strides = [1, 1]} : vector<2x128xf32> to vector<2x32xf32>
    %473 = arith.negf %472 : vector<2x32xf32>
    %474 = math.exp %473 : vector<2x32xf32>
    %cst_112 = arith.constant 1.000000e+00 : f32
    %475 = vector.broadcast %cst_112 : f32 to vector<2x32xf32>
    %476 = arith.addf %475, %474 : vector<2x32xf32>
    %477 = arith.divf %475, %476 : vector<2x32xf32>
    %478 = vector.extract_strided_slice %471 {offsets = [0, 32], sizes = [2, 32], strides = [1, 1]} : vector<2x128xf32> to vector<2x32xf32>
    %479 = arith.negf %478 : vector<2x32xf32>
    %480 = math.exp %479 : vector<2x32xf32>
    %cst_113 = arith.constant 1.000000e+00 : f32
    %481 = vector.broadcast %cst_113 : f32 to vector<2x32xf32>
    %482 = arith.addf %481, %480 : vector<2x32xf32>
    %483 = arith.divf %481, %482 : vector<2x32xf32>
    %484 = vector.extract_strided_slice %471 {offsets = [0, 64], sizes = [2, 32], strides = [1, 1]} : vector<2x128xf32> to vector<2x32xf32>
    %485 = math.tanh %484 : vector<2x32xf32>
    %486 = vector.extract_strided_slice %471 {offsets = [0, 96], sizes = [2, 32], strides = [1, 1]} : vector<2x128xf32> to vector<2x32xf32>
    %487 = arith.negf %486 : vector<2x32xf32>
    %488 = math.exp %487 : vector<2x32xf32>
    %cst_114 = arith.constant 1.000000e+00 : f32
    %489 = vector.broadcast %cst_114 : f32 to vector<2x32xf32>
    %490 = arith.addf %489, %488 : vector<2x32xf32>
    %491 = arith.divf %489, %490 : vector<2x32xf32>
    %492 = arith.mulf %483, %423 : vector<2x32xf32>
    %493 = arith.mulf %477, %485 : vector<2x32xf32>
    %494 = arith.addf %492, %493 : vector<2x32xf32>
    %495 = math.tanh %494 : vector<2x32xf32>
    %496 = arith.mulf %491, %495 : vector<2x32xf32>
    %497 = arith.index_cast %465 : i32 to index
    %c0_115 = arith.constant 0 : index
    %c32_116 = arith.constant 32 : index
    %498 = vector.load %arg3[%497, %c0_115, %c32_116] : memref<8x2x64xf32, #tpu.memory_space<vmem>>, vector<1x2x32xf32>
    %499 = vector.shape_cast %498 : vector<1x2x32xf32> to vector<2x32xf32>
    %500 = vector.shape_cast %496 : vector<2x32xf32> to vector<1x2x32xf32>
    tpu.vector_store %arg3[%497, %c0_115, %c32_116], %500 {strides = array<i32>} : memref<8x2x64xf32, #tpu.memory_space<vmem>>, vector<1x2x32xf32>,
    %c7_i32_117 = arith.constant 7 : i32
    %501 = arith.index_cast %c7_i32_117 : i32 to index
    %c0_118 = arith.constant 0 : index
    %c0_119 = arith.constant 0 : index
    %502 = vector.load %arg1[%501, %c0_118, %c0_119] : memref<8x2x256xf32, #tpu.memory_space<vmem>>, vector<1x2x128xf32>
    %503 = vector.shape_cast %502 : vector<1x2x128xf32> to vector<2x128xf32>
    %504 = arith.truncf %460 : vector<2x32xf32> to vector<2x32xbf16>
    %cst_120 = arith.constant dense<0.000000e+00> : vector<2x128xf32>
    %505 = tpu.matmul %504, %1, %cst_120 {dimension_numbers = #tpu.dot_dimension_numbers<[1], [0], [0], [1], [0, 0, 1, 1], [], []>} : vector<2x32xbf16>, vector<32x128xbf16>, vector<2x128xf32> -> vector<2x128xf32>
    %506 = arith.addf %503, %505 : vector<2x128xf32>
    %507 = vector.extract_strided_slice %506 {offsets = [0, 0], sizes = [2, 32], strides = [1, 1]} : vector<2x128xf32> to vector<2x32xf32>
    %508 = arith.negf %507 : vector<2x32xf32>
    %509 = math.exp %508 : vector<2x32xf32>
    %cst_121 = arith.constant 1.000000e+00 : f32
    %510 = vector.broadcast %cst_121 : f32 to vector<2x32xf32>
    %511 = arith.addf %510, %509 : vector<2x32xf32>
    %512 = arith.divf %510, %511 : vector<2x32xf32>
    %513 = vector.extract_strided_slice %506 {offsets = [0, 32], sizes = [2, 32], strides = [1, 1]} : vector<2x128xf32> to vector<2x32xf32>
    %514 = arith.negf %513 : vector<2x32xf32>
    %515 = math.exp %514 : vector<2x32xf32>
    %cst_122 = arith.constant 1.000000e+00 : f32
    %516 = vector.broadcast %cst_122 : f32 to vector<2x32xf32>
    %517 = arith.addf %516, %515 : vector<2x32xf32>
    %518 = arith.divf %516, %517 : vector<2x32xf32>
    %519 = vector.extract_strided_slice %506 {offsets = [0, 64], sizes = [2, 32], strides = [1, 1]} : vector<2x128xf32> to vector<2x32xf32>
    %520 = math.tanh %519 : vector<2x32xf32>
    %521 = vector.extract_strided_slice %506 {offsets = [0, 96], sizes = [2, 32], strides = [1, 1]} : vector<2x128xf32> to vector<2x32xf32>
    %522 = arith.negf %521 : vector<2x32xf32>
    %523 = math.exp %522 : vector<2x32xf32>
    %cst_123 = arith.constant 1.000000e+00 : f32
    %524 = vector.broadcast %cst_123 : f32 to vector<2x32xf32>
    %525 = arith.addf %524, %523 : vector<2x32xf32>
    %526 = arith.divf %524, %525 : vector<2x32xf32>
    %527 = arith.mulf %518, %458 : vector<2x32xf32>
    %528 = arith.mulf %512, %520 : vector<2x32xf32>
    %529 = arith.addf %527, %528 : vector<2x32xf32>
    %530 = math.tanh %529 : vector<2x32xf32>
    %531 = arith.mulf %526, %530 : vector<2x32xf32>
    %532 = arith.index_cast %c7_i32_117 : i32 to index
    %c0_124 = arith.constant 0 : index
    %c0_125 = arith.constant 0 : index
    %533 = vector.load %arg3[%532, %c0_124, %c0_125] : memref<8x2x64xf32, #tpu.memory_space<vmem>>, vector<1x2x32xf32>
    %534 = vector.shape_cast %533 : vector<1x2x32xf32> to vector<2x32xf32>
    %535 = vector.shape_cast %531 : vector<2x32xf32> to vector<1x2x32xf32>
    tpu.vector_store %arg3[%532, %c0_124, %c0_125], %535 {strides = array<i32>} : memref<8x2x64xf32, #tpu.memory_space<vmem>>, vector<1x2x32xf32>,
    %c7_i32_126 = arith.constant 7 : i32
    %536 = arith.subi %c7_i32_126, %c7_i32_117 : i32
    %537 = arith.index_cast %536 : i32 to index
    %c0_127 = arith.constant 0 : index
    %c128_128 = arith.constant 128 : index
    %538 = vector.load %arg1[%537, %c0_127, %c128_128] : memref<8x2x256xf32, #tpu.memory_space<vmem>>, vector<1x2x128xf32>
    %539 = vector.shape_cast %538 : vector<1x2x128xf32> to vector<2x128xf32>
    %540 = arith.truncf %496 : vector<2x32xf32> to vector<2x32xbf16>
    %cst_129 = arith.constant dense<0.000000e+00> : vector<2x128xf32>
    %541 = tpu.matmul %540, %2, %cst_129 {dimension_numbers = #tpu.dot_dimension_numbers<[1], [0], [0], [1], [0, 0, 1, 1], [], []>} : vector<2x32xbf16>, vector<32x128xbf16>, vector<2x128xf32> -> vector<2x128xf32>
    %542 = arith.addf %539, %541 : vector<2x128xf32>
    %543 = vector.extract_strided_slice %542 {offsets = [0, 0], sizes = [2, 32], strides = [1, 1]} : vector<2x128xf32> to vector<2x32xf32>
    %544 = arith.negf %543 : vector<2x32xf32>
    %545 = math.exp %544 : vector<2x32xf32>
    %cst_130 = arith.constant 1.000000e+00 : f32
    %546 = vector.broadcast %cst_130 : f32 to vector<2x32xf32>
    %547 = arith.addf %546, %545 : vector<2x32xf32>
    %548 = arith.divf %546, %547 : vector<2x32xf32>
    %549 = vector.extract_strided_slice %542 {offsets = [0, 32], sizes = [2, 32], strides = [1, 1]} : vector<2x128xf32> to vector<2x32xf32>
    %550 = arith.negf %549 : vector<2x32xf32>
    %551 = math.exp %550 : vector<2x32xf32>
    %cst_131 = arith.constant 1.000000e+00 : f32
    %552 = vector.broadcast %cst_131 : f32 to vector<2x32xf32>
    %553 = arith.addf %552, %551 : vector<2x32xf32>
    %554 = arith.divf %552, %553 : vector<2x32xf32>
    %555 = vector.extract_strided_slice %542 {offsets = [0, 64], sizes = [2, 32], strides = [1, 1]} : vector<2x128xf32> to vector<2x32xf32>
    %556 = math.tanh %555 : vector<2x32xf32>
    %557 = vector.extract_strided_slice %542 {offsets = [0, 96], sizes = [2, 32], strides = [1, 1]} : vector<2x128xf32> to vector<2x32xf32>
    %558 = arith.negf %557 : vector<2x32xf32>
    %559 = math.exp %558 : vector<2x32xf32>
    %cst_132 = arith.constant 1.000000e+00 : f32
    %560 = vector.broadcast %cst_132 : f32 to vector<2x32xf32>
    %561 = arith.addf %560, %559 : vector<2x32xf32>
    %562 = arith.divf %560, %561 : vector<2x32xf32>
    %563 = arith.mulf %554, %494 : vector<2x32xf32>
    %564 = arith.mulf %548, %556 : vector<2x32xf32>
    %565 = arith.addf %563, %564 : vector<2x32xf32>
    %566 = math.tanh %565 : vector<2x32xf32>
    %567 = arith.mulf %562, %566 : vector<2x32xf32>
    %568 = arith.index_cast %536 : i32 to index
    %c0_133 = arith.constant 0 : index
    %c32_134 = arith.constant 32 : index
    %569 = vector.load %arg3[%568, %c0_133, %c32_134] : memref<8x2x64xf32, #tpu.memory_space<vmem>>, vector<1x2x32xf32>
    %570 = vector.shape_cast %569 : vector<1x2x32xf32> to vector<2x32xf32>
    %571 = vector.shape_cast %567 : vector<2x32xf32> to vector<1x2x32xf32>
    tpu.vector_store %arg3[%568, %c0_133, %c32_134], %571 {strides = array<i32>} : memref<8x2x64xf32, #tpu.memory_space<vmem>>, vector<1x2x32xf32>,
    %c8_i32 = arith.constant 8 : i32
    %c0_135 = arith.constant 0 : index
    %c0_136 = arith.constant 0 : index
    %572 = vector.load %arg4[%c0_135, %c0_136] : memref<2x64xf32, #tpu.memory_space<vmem>>, vector<2x32xf32>
    tpu.vector_store %arg4[%c0_135, %c0_136], %531 {strides = array<i32>} : memref<2x64xf32, #tpu.memory_space<vmem>>, vector<2x32xf32>,
    %c0_137 = arith.constant 0 : index
    %c32_138 = arith.constant 32 : index
    %573 = vector.load %arg4[%c0_137, %c32_138] : memref<2x64xf32, #tpu.memory_space<vmem>>, vector<2x32xf32>
    tpu.vector_store %arg4[%c0_137, %c32_138], %567 {strides = array<i32>} : memref<2x64xf32, #tpu.memory_space<vmem>>, vector<2x32xf32>,
    %c0_139 = arith.constant 0 : index
    %c0_140 = arith.constant 0 : index
    %574 = vector.load %arg5[%c0_139, %c0_140] : memref<2x64xf32, #tpu.memory_space<vmem>>, vector<2x32xf32>
    tpu.vector_store %arg5[%c0_139, %c0_140], %529 {strides = array<i32>} : memref<2x64xf32, #tpu.memory_space<vmem>>, vector<2x32xf32>,
    %c0_141 = arith.constant 0 : index
    %c32_142 = arith.constant 32 : index
    %575 = vector.load %arg5[%c0_141, %c32_142] : memref<2x64xf32, #tpu.memory_space<vmem>>, vector<2x32xf32>
    tpu.vector_store %arg5[%c0_141, %c32_142], %565 {strides = array<i32>} : memref<2x64xf32, #tpu.memory_space<vmem>>, vector<2x32xf32>,
    return
  }
  func.func @transform_0(%arg0: i32) -> (i32, i32, i32) {
    %c0_i32 = arith.constant 0 : i32
    %c0_i32_0 = arith.constant 0 : i32
    %c0_i32_1 = arith.constant 0 : i32
    return %c0_i32, %arg0, %c0_i32_0 : i32, i32, i32
  }
  func.func @transform_1(%arg0: i32) -> (i32, i32) {
    %c0_i32 = arith.constant 0 : i32
    %c0_i32_0 = arith.constant 0 : i32
    %c0_i32_1 = arith.constant 0 : i32
    return %c0_i32, %c0_i32_0 : i32, i32
  }
  func.func @transform_2(%arg0: i32) -> (i32, i32, i32) {
    %c0_i32 = arith.constant 0 : i32
    %c0_i32_0 = arith.constant 0 : i32
    %c0_i32_1 = arith.constant 0 : i32
    return %c0_i32, %arg0, %c0_i32_0 : i32, i32, i32
  }
  func.func @transform_3(%arg0: i32) -> (i32, i32) {
    %c0_i32 = arith.constant 0 : i32
    %c0_i32_0 = arith.constant 0 : i32
    return %arg0, %c0_i32 : i32, i32
  }
  func.func @transform_4(%arg0: i32) -> (i32, i32) {
    %c0_i32 = arith.constant 0 : i32
    %c0_i32_0 = arith.constant 0 : i32
    return %arg0, %c0_i32 : i32, i32
  }
}

</mosaic_0001>

<bundles_post_ra>
// kernel: encoder_forward.1
= control target key start
LH: loop header
LB: loop body
LE: loop exit
PB: predicated region body
PF: predicated region fallthrough
CT: control target
= control target key end

     0   :  { %10 = vsyncpa [#allocation3], 0  ;;  %v1904_v1 = vmov 0.0   ;;  %vm1905_vm0 = vmmov 0   ;;  %s2390_s0 = inlined_call_operand.vmem [shape: f32[8,2,256], index: 0, kind: input, shape index: {}]   ;;  %s2391_s1 = inlined_call_operand.vmem [shape: bf16[32,256], index: 1, kind: input, shape index: {}]   ;;  %s2392_s2 = inlined_call_operand.hbm [shape: f32[8,2,64], index: 2, kind: output, shape index: {0}]   ;;  %s2393_s3 = inlined_call_operand.hbm [shape: f32[2,64], index: 3, kind: output, shape index: {1}]   ;;  %s2394_s4 = inlined_call_operand.hbm [shape: f32[2,64], index: 4, kind: output, shape index: {2}]  }
   0x1   :  { %v1943_v0 = vld [vmem:[%s2391_s1] ss:$8 sps:$4 sm:$0xff]   ;;  %1561 = vmatprep.subr.bf16.mxu0 %v1904_v1  ;;  %1569 = vmatprep.subr.bf16.mxu1 %v1904_v1  ;;  %v1950_v2 = vld [vmem:[%s2391_s1 + $0x4] ss:$8 sps:$4 sm:$0xff]   ;;  %v1956_v3 = vld [vmem:[%s2391_s1 + $0x10] ss:$8 sps:$4 sm:$0xff]  }
   0x2   :  { %1562 = vmatpush3.bf16.msra.mxu0 %v1943_v0  ;;  %1565 = vmatprep.mubr.msk.bf16.mxu0 %vm1905_vm0, %v1904_v1  ;;  %v1965_v4 = vld [vmem:[%s2391_s1 + $0x14] ss:$8 sps:$4 sm:$0xff]  }
   0x3   :  { %1570 = vmatpush3.bf16.msra.mxu1 %v1950_v2  ;;  %1563 = vmatprep.subr.bf16.mxu0 %v1904_v1 }
   0x4   :  { %11 = vsyncpa [#allocation5], 0  ;;  %1571 = vmatprep.subr.bf16.mxu1 %v1904_v1  ;;  %1573 = vmatprep.mubr.msk.bf16.mxu1 %vm1905_vm0, %v1904_v1  ;;  %v1906_v5 = vmov 0   ;;  %v21_v6 = vld [vmem:[%s2390_s0] sm:$0x3]  ;;  %s1907_s26 = smov 64  }
   0x5   :  { %v1468_v7 = vld [vmem:[%s2390_s0 + $0x1e] sm:$0x3]  ;;  %s1908_s27 = smov 32   ;;  %vm34_vm1 = vcmask 261120   ;;  %v1472_v48 = vld [vmem:[%s2390_s0 + $0x4] sm:$0x3] }
   0x6   :  { %1564 = vmatpush3.bf16.msra.mxu0 %v1956_v3  ;;  %v1475_v53 = vld [vmem:[%s2390_s0 + $0x1a] sm:$0x3]  ;;  %vm203_vm2 = vcmask 517376   ;;  %vm114_vm3 = vcmask 254976   ;;  %s1912_s6 = smov [#allocation6]   ;;  %s1913_s8 = smov [#allocation2]  }
   0x7   :  { %1572 = vmatpush3.bf16.msra.mxu1 %v1965_v4  ;;  %1577 = vmatprep.subr.bf16.mxu0 %v1904_v1  ;;  %s1450_s7 = sshll.u32 %s1912_s6, 4  ;;  %s1427_s9 = sshll.u32 %s1913_s8, 4  ;;  %s2334_s7 = int_to_ptr.vmem [resolvable:$true] %s1450_s7  ;;  %s2339_s9 = int_to_ptr.vmem [resolvable:$true] %s1427_s9 }
   0x8   :  { %1585 = vmatprep.subr.bf16.mxu1 %v1904_v1 }
   0x9   :  { %1566 = vmatmul.mubr.bf16.vlgmr.msra.gmra.mrb[0].mxu0 %v1906_v5 }
   0xa   :  { %1574 = vmatmul.mubr.bf16.vlgmr.msra.gmra.mrb[0].mxu1 %v1906_v5  ;;  %1578 = vmatpush3.bf16.msra.mxu0 %v1943_v0 }
   0xb   :  { %1579 = vmatprep.subr.bf16.mxu0 %v1904_v1  ;;  %1586 = vmatpush3.bf16.msra.mxu1 %v1950_v2 }
   0xc   :  { %1581 = vmatprep.mubr.msk.bf16.mxu0 %vm1905_vm0, %v1904_v1  ;;  %1587 = vmatprep.subr.bf16.mxu1 %v1904_v1 }
   0xd   :  { %1589 = vmatprep.mubr.msk.bf16.mxu1 %vm1905_vm0, %v1904_v1 }
   0xe   :  { %1580 = vmatpush3.bf16.msra.mxu0 %v1956_v3 }
   0xf   :  { %1588 = vmatpush3.bf16.msra.mxu1 %v1965_v4  ;;  %1593 = vmatprep.subr.bf16.mxu0 %v1904_v1 }
  0x10   :  { %1601 = vmatprep.subr.bf16.mxu1 %v1904_v1 }
  0xdc   :  { %v72_v8 = vpop.f32.mrb[0].mxu0 }
  0xdd   :  { %v78_v9 = vadd.f32 %v72_v8, %v21_v6  ;;  %v1567_v10 = vpop.f32.mrb[1].mxu0  ;;  %v160_v11 = vpop.f32.mrb[0].mxu1 }
  0xde   :  { %v166_v12 = vadd.f32 %v1468_v7, %v160_v11  ;;  %v75_v13 = vpop.f32.mrb[2].mxu0  ;;  %v1575_v14 = vpop.f32.mrb[1].mxu1 }
  0xdf   :  { %1706 = vtanh.f32 %v78_v9  ;;  %v1568_v15 = vpop.f32.mrb[3].mxu0  ;;  %v163_v16 = vpop.f32.mrb[2].mxu1  ;;  %v1467_v20 = vmul.f32 -1.442695, %v78_v9 }
  0xe0   :  { %v1576_v17 = vpop.f32.mrb[3].mxu1  ;;  %1708 = vtanh.f32 %v166_v12  ;;  %v1471_v21 = vmul.f32 -1.442695, %v166_v12 }
  0xe1   :  { %1710 = vpow2.f32 %v1467_v20 }
  0xe2   :  { %1712 = vpow2.f32 %v1471_v21 }
  0xe9   :  { %v1707_v18 = vpop.eup %1706 }
  0xea   :  { %88 = vrot.lane.b32.xlu0 %v1707_v18, %s1907_s26  ;;  %v1709_v19 = vpop.eup %1708 }
  0xeb   :  { %v1711_v22 = vpop.eup %1710 }
  0xec   :  { %v82_v23 = vadd.f32 1.0, %v1711_v22  ;;  %v1713_v24 = vpop.eup %1712 }
  0xed   :  { %v170_v25 = vadd.f32 1.0, %v1713_v24 }
  0xee   :  { %176 = vrot.lane.b32.xlu0 %v1709_v19, %s1907_s26  ;;  %1714 = vrcp.f32 %v82_v23 }
  0xef   :  { %1716 = vrcp.f32 %v170_v25 }
  0xf8   :  { %v1715_v26 = vpop.eup %1714 }
  0xf9   :  { %v1717_v29 = vpop.eup %1716  ;;  %v86_v32 = vmul.f32 0.0, %v1715_v26 }
  0xfa   :  { %v174_v35 = vmul.f32 0.0, %v1717_v29 }
 0x15c   :  { %v89_v27 = vpop.permute.xlu0 %88 }
 0x15d   :  { %v91_v28 = vmul.f32 %v1715_v26, %v89_v27 }
 0x15f   :  { %93 = vrot.lane.b32.xlu1 %v91_v28, %s1908_s27 }
 0x160   :  { %v177_v30 = vpop.permute.xlu0 %176 }
 0x161   :  { %v179_v31 = vmul.f32 %v1717_v29, %v177_v30 }
 0x163   :  { %181 = vrot.lane.b32.xlu1 %v179_v31, %s1908_s27  ;;  %v1478_v31 = vld [vmem:[%s2390_s0 + $0x8] sm:$0x3] }
 0x1d1   :  { %v94_v33 = vpop.permute.xlu1 %93 }
 0x1d2   :  { %v1996_v34 = vadd.f32 %v94_v33, %v86_v32 }
 0x1d4   :  { %1718 = vtanh.f32 %v1996_v34 }
 0x1d5   :  { %v182_v36 = vpop.permute.xlu1 %181 }
 0x1d6   :  { %v1999_v37 = vadd.f32 %v182_v36, %v174_v35  ;;  %v1481_v36 = vld [vmem:[%s2390_s0 + $0x16] sm:$0x3] }
 0x1d8   :  { %1720 = vtanh.f32 %v1999_v37 }
 0x1de   :  { %v1719_v38 = vpop.eup %1718 }
 0x1df   :  { %99 = vrot.lane.b32.xlu0 %v1719_v38, %s1907_s26 }
 0x1e2   :  { %v1721_v39 = vpop.eup %1720 }
 0x1e3   :  { %187 = vrot.lane.b32.xlu1 %v1721_v39, %s1907_s26 }
 0x251   :  { %v100_v40 = vpop.permute.xlu0 %99 }
 0x252   :  { %v2004_v41 = vmul.f32 %v1715_v26, %v100_v40 }
 0x254   :  { %v207_v42 = vpack.c.bf16 %v2004_v41, %v2004_v41 }
 0x255   :  { %v188_v43 = vpop.permute.xlu1 %187 }
 0x256   :  { %v2008_v44 = vmul.f32 %v1717_v29, %v188_v43  ;;  %209 = vrot.lane.b32.xlu0 %v207_v42, %s1908_s27 }
 0x258   :  { %v294_v45 = vpack.c.bf16 %v2008_v44, %v2008_v44 }
 0x25a   :  { %296 = vrot.lane.b32.xlu1 %v294_v45, %s1908_s27 }
 0x2c8   :  { %v210_v46 = vpop.permute.xlu0 %209 }
 0x2c9   :  { %1582 = vmatmul.mubr.msk.bf16.vlgmr.msra.gmra.mrb[4].mxu0 %vm34_vm1, %v210_v46 }
 0x2ca   :  { %1594 = vmatpush3.bf16.msra.mxu0 %v1943_v0  ;;  %1597 = vmatprep.mubr.msk.bf16.mxu0 %vm1905_vm0, %v1904_v1 }
 0x2cb   :  { %1595 = vmatprep.subr.bf16.mxu0 %v1904_v1 }
 0x2cc   :  { %v297_v47 = vpop.permute.xlu1 %296 }
 0x2cd   :  { %1590 = vmatmul.mubr.msk.bf16.vlgmr.msra.gmra.mrb[4].mxu1 %vm34_vm1, %v297_v47 }
 0x2ce   :  { %1602 = vmatpush3.bf16.msra.mxu1 %v1950_v2  ;;  %1596 = vmatpush3.bf16.msra.mxu0 %v1956_v3 }
 0x2cf   :  { %1603 = vmatprep.subr.bf16.mxu1 %v1904_v1  ;;  %1605 = vmatprep.mubr.msk.bf16.mxu1 %vm1905_vm0, %v1904_v1 }
 0x2d0   :  { %1609 = vmatprep.subr.bf16.mxu0 %v1904_v1 }
 0x2d2   :  { %1604 = vmatpush3.bf16.msra.mxu1 %v1965_v4 }
 0x2d3   :  { %1617 = vmatprep.subr.bf16.mxu1 %v1904_v1 }
 0x39c   :  { %v248_v49 = vpop.f32.mrb[4].mxu0 }
 0x39d   :  { %v254_v50 = vadd.f32 %v1472_v48, %v248_v49  ;;  %v1583_v51 = vpop.f32.mrb[5].mxu0 }
 0x39e   :  { %v251_v52 = vpop.f32.mrb[6].mxu0 }
 0x39f   :  { %1722 = vtanh.f32 %v254_v50  ;;  %v1584_v54 = vpop.f32.mrb[7].mxu0  ;;  %v1474_v62 = vmul.f32 -1.442695, %v254_v50 }
 0x3a0   :  { %v335_v55 = vpop.f32.mrb[4].mxu1 }
 0x3a1   :  { %v341_v56 = vadd.f32 %v1475_v53, %v335_v55  ;;  %v1591_v57 = vpop.f32.mrb[5].mxu1 }
 0x3a2   :  { %v338_v58 = vpop.f32.mrb[6].mxu1 }
 0x3a3   :  { %1724 = vtanh.f32 %v341_v56  ;;  %v1592_v59 = vpop.f32.mrb[7].mxu1  ;;  %v1477_v63 = vmul.f32 -1.442695, %v341_v56 }
 0x3a4   :  { %1726 = vpow2.f32 %v1474_v62 }
 0x3a5   :  { %1728 = vpow2.f32 %v1477_v63 }
 0x3a9   :  { %v1723_v60 = vpop.eup %1722 }
 0x3aa   :  { %264 = vrot.lane.b32.xlu0 %v1723_v60, %s1907_s26 }
 0x3ad   :  { %v1725_v61 = vpop.eup %1724 }
 0x3ae   :  { %351 = vrot.lane.b32.xlu1 %v1725_v61, %s1907_s26  ;;  %v1727_v5 = vpop.eup %1726 }
 0x3af   :  { %v258_v6 = vadd.f32 1.0, %v1727_v5  ;;  %v1729_v7 = vpop.eup %1728 }
 0x3b0   :  { %v345_v8 = vadd.f32 1.0, %v1729_v7 }
 0x3b1   :  { %1730 = vrcp.f32 %v258_v6 }
 0x3b2   :  { %1732 = vrcp.f32 %v345_v8 }
 0x3bb   :  { %v1731_v9 = vpop.eup %1730 }
 0x3bc   :  { %v1733_v12 = vpop.eup %1732  ;;  %v262_v15 = vmul.f32 %v1731_v9, %v1996_v34 }
 0x3bd   :  { %v349_v18 = vmul.f32 %v1733_v12, %v1999_v37 }
 0x41c   :  { %v265_v10 = vpop.permute.xlu0 %264 }
 0x41d   :  { %v267_v11 = vmul.f32 %v1731_v9, %v265_v10 }
 0x41f   :  { %269 = vrot.lane.b32.xlu0 %v267_v11, %s1908_s27 }
 0x420   :  { %v352_v13 = vpop.permute.xlu1 %351 }
 0x421   :  { %v354_v14 = vmul.f32 %v1733_v12, %v352_v13 }
 0x423   :  { %356 = vrot.lane.b32.xlu1 %v354_v14, %s1908_s27 }
 0x491   :  { %v270_v16 = vpop.permute.xlu0 %269 }
 0x492   :  { %v2039_v17 = vadd.f32 %v270_v16, %v262_v15  ;;  %v1484_v16 = vld [vmem:[%s2390_s0 + $0xc] sm:$0x3] }
 0x494   :  { %1734 = vtanh.f32 %v2039_v17 }
 0x495   :  { %v357_v19 = vpop.permute.xlu1 %356 }
 0x496   :  { %v2043_v20 = vadd.f32 %v357_v19, %v349_v18 }
 0x498   :  { %1736 = vtanh.f32 %v2043_v20 }
 0x49e   :  { %v1735_v21 = vpop.eup %1734 }
 0x49f   :  { %275 = vrot.lane.b32.xlu0 %v1735_v21, %s1907_s26  ;;  %v1487_v21 = vld [vmem:[%s2390_s0 + $0x12] sm:$0x3] }
 0x4a2   :  { %v1737_v22 = vpop.eup %1736 }
 0x4a3   :  { %362 = vrot.lane.b32.xlu1 %v1737_v22, %s1907_s26 }
 0x511   :  { %v276_v23 = vpop.permute.xlu0 %275 }
 0x512   :  { %v2048_v24 = vmul.f32 %v1731_v9, %v276_v23 }
 0x514   :  { %v381_v25 = vpack.c.bf16 %v2048_v24, %v2048_v24 }
 0x515   :  { %v363_v26 = vpop.permute.xlu1 %362 }
 0x516   :  { %v2052_v27 = vmul.f32 %v1733_v12, %v363_v26  ;;  %383 = vrot.lane.b32.xlu0 %v381_v25, %s1908_s27 }
 0x518   :  { %v468_v28 = vpack.c.bf16 %v2052_v27, %v2052_v27 }
 0x51a   :  { %470 = vrot.lane.b32.xlu1 %v468_v28, %s1908_s27 }
 0x588   :  { %v384_v29 = vpop.permute.xlu0 %383 }
 0x589   :  { %1598 = vmatmul.mubr.msk.bf16.vlgmr.msra.gmra.mrb[8].mxu0 %vm34_vm1, %v384_v29 }
 0x58a   :  { %1610 = vmatpush3.bf16.msra.mxu0 %v1943_v0  ;;  %1613 = vmatprep.mubr.msk.bf16.mxu0 %vm1905_vm0, %v1904_v1 }
 0x58b   :  { %1611 = vmatprep.subr.bf16.mxu0 %v1904_v1 }
 0x58c   :  { %v471_v30 = vpop.permute.xlu1 %470 }
 0x58d   :  { %1606 = vmatmul.mubr.msk.bf16.vlgmr.msra.gmra.mrb[8].mxu1 %vm34_vm1, %v471_v30 }
 0x58e   :  { %1618 = vmatpush3.bf16.msra.mxu1 %v1950_v2  ;;  %1612 = vmatpush3.bf16.msra.mxu0 %v1956_v3 }
 0x58f   :  { %1619 = vmatprep.subr.bf16.mxu1 %v1904_v1  ;;  %1621 = vmatprep.mubr.msk.bf16.mxu1 %vm1905_vm0, %v1904_v1 }
 0x590   :  { %1625 = vmatprep.subr.bf16.mxu0 %v1904_v1 }
 0x592   :  { %1620 = vmatpush3.bf16.msra.mxu1 %v1965_v4 }
 0x593   :  { %1633 = vmatprep.subr.bf16.mxu1 %v1904_v1 }
 0x65c   :  { %v422_v32 = vpop.f32.mrb[8].mxu0 }
 0x65d   :  { %v428_v33 = vadd.f32 %v1478_v31, %v422_v32  ;;  %v1599_v34 = vpop.f32.mrb[9].mxu0 }
 0x65e   :  { %v425_v35 = vpop.f32.mrb[10].mxu0 }
 0x65f   :  { %1738 = vtanh.f32 %v428_v33  ;;  %v1600_v37 = vpop.f32.mrb[11].mxu0  ;;  %v1480_v47 = vmul.f32 -1.442695, %v428_v33 }
 0x660   :  { %v509_v38 = vpop.f32.mrb[8].mxu1 }
 0x661   :  { %v515_v39 = vadd.f32 %v1481_v36, %v509_v38  ;;  %v1607_v40 = vpop.f32.mrb[9].mxu1 }
 0x662   :  { %v512_v42 = vpop.f32.mrb[10].mxu1 }
 0x663   :  { %1740 = vtanh.f32 %v515_v39  ;;  %v1608_v43 = vpop.f32.mrb[11].mxu1  ;;  %v1483_v48 = vmul.f32 -1.442695, %v515_v39 }
 0x664   :  { %1742 = vpow2.f32 %v1480_v47 }
 0x665   :  { %1744 = vpow2.f32 %v1483_v48 }
 0x669   :  { %v1739_v45 = vpop.eup %1738 }
 0x66a   :  { %438 = vrot.lane.b32.xlu0 %v1739_v45, %s1907_s26 }
 0x66d   :  { %v1741_v46 = vpop.eup %1740 }
 0x66e   :  { %525 = vrot.lane.b32.xlu1 %v1741_v46, %s1907_s26  ;;  %v1743_v49 = vpop.eup %1742 }
 0x66f   :  { %v432_v50 = vadd.f32 1.0, %v1743_v49  ;;  %v1745_v51 = vpop.eup %1744 }
 0x670   :  { %v519_v52 = vadd.f32 1.0, %v1745_v51 }
 0x671   :  { %1746 = vrcp.f32 %v432_v50 }
 0x672   :  { %1748 = vrcp.f32 %v519_v52 }
 0x67b   :  { %v1747_v53 = vpop.eup %1746 }
 0x67c   :  { %v1749_v56 = vpop.eup %1748  ;;  %v436_v59 = vmul.f32 %v1747_v53, %v2039_v17 }
 0x67d   :  { %v523_v62 = vmul.f32 %v1749_v56, %v2043_v20 }
 0x6dc   :  { %v439_v54 = vpop.permute.xlu0 %438 }
 0x6dd   :  { %v441_v55 = vmul.f32 %v1747_v53, %v439_v54 }
 0x6df   :  { %443 = vrot.lane.b32.xlu0 %v441_v55, %s1908_s27 }
 0x6e0   :  { %v526_v57 = vpop.permute.xlu1 %525 }
 0x6e1   :  { %v528_v58 = vmul.f32 %v1749_v56, %v526_v57 }
 0x6e3   :  { %530 = vrot.lane.b32.xlu1 %v528_v58, %s1908_s27 }
 0x751   :  { %v444_v60 = vpop.permute.xlu0 %443 }
 0x752   :  { %v2083_v61 = vadd.f32 %v444_v60, %v436_v59 }
 0x754   :  { %1750 = vtanh.f32 %v2083_v61 }
 0x755   :  { %v531_v63 = vpop.permute.xlu1 %530 }
 0x756   :  { %v2087_v5 = vadd.f32 %v531_v63, %v523_v62  ;;  %v1490_v62 = vld [vmem:[%s2390_s0 + $0x10] sm:$0x3] }
 0x758   :  { %1752 = vtanh.f32 %v2087_v5 }
 0x75e   :  { %v1751_v6 = vpop.eup %1750 }
 0x75f   :  { %449 = vrot.lane.b32.xlu0 %v1751_v6, %s1907_s26 }
 0x762   :  { %v1753_v7 = vpop.eup %1752 }
 0x763   :  { %536 = vrot.lane.b32.xlu1 %v1753_v7, %s1907_s26 }
 0x7d1   :  { %v450_v8 = vpop.permute.xlu0 %449 }
 0x7d2   :  { %v2092_v9 = vmul.f32 %v1747_v53, %v450_v8  ;;  %v1493_v8 = vld [vmem:[%s2390_s0 + $0xe] sm:$0x3] }
 0x7d4   :  { %v555_v10 = vpack.c.bf16 %v2092_v9, %v2092_v9 }
 0x7d5   :  { %v537_v11 = vpop.permute.xlu1 %536 }
 0x7d6   :  { %v2096_v12 = vmul.f32 %v1749_v56, %v537_v11  ;;  %557 = vrot.lane.b32.xlu0 %v555_v10, %s1908_s27 }
 0x7d8   :  { %v642_v13 = vpack.c.bf16 %v2096_v12, %v2096_v12 }
 0x7da   :  { %644 = vrot.lane.b32.xlu1 %v642_v13, %s1908_s27 }
 0x848   :  { %v558_v14 = vpop.permute.xlu0 %557 }
 0x849   :  { %1614 = vmatmul.mubr.msk.bf16.vlgmr.msra.gmra.mrb[12].mxu0 %vm34_vm1, %v558_v14 }
 0x84a   :  { %1626 = vmatpush3.bf16.msra.mxu0 %v1943_v0  ;;  %1629 = vmatprep.mubr.msk.bf16.mxu0 %vm1905_vm0, %v1904_v1 }
 0x84b   :  { %1627 = vmatprep.subr.bf16.mxu0 %v1904_v1 }
 0x84c   :  { %v645_v15 = vpop.permute.xlu1 %644 }
 0x84d   :  { %1622 = vmatmul.mubr.msk.bf16.vlgmr.msra.gmra.mrb[12].mxu1 %vm34_vm1, %v645_v15 }
 0x84e   :  { %1634 = vmatpush3.bf16.msra.mxu1 %v1950_v2  ;;  %1628 = vmatpush3.bf16.msra.mxu0 %v1956_v3 }
 0x84f   :  { %1635 = vmatprep.subr.bf16.mxu1 %v1904_v1  ;;  %1637 = vmatprep.mubr.msk.bf16.mxu1 %vm1905_vm0, %v1904_v1 }
 0x850   :  { %1641 = vmatprep.subr.bf16.mxu0 %v1904_v1 }
 0x852   :  { %1636 = vmatpush3.bf16.msra.mxu1 %v1965_v4 }
 0x853   :  { %1649 = vmatprep.subr.bf16.mxu1 %v1904_v1 }
 0x91c   :  { %v596_v17 = vpop.f32.mrb[12].mxu0 }
 0x91d   :  { %v602_v18 = vadd.f32 %v1484_v16, %v596_v17  ;;  %v1615_v19 = vpop.f32.mrb[13].mxu0 }
 0x91e   :  { %v599_v20 = vpop.f32.mrb[14].mxu0 }
 0x91f   :  { %1754 = vtanh.f32 %v602_v18  ;;  %v1616_v22 = vpop.f32.mrb[15].mxu0  ;;  %v1486_v32 = vmul.f32 -1.442695, %v602_v18 }
 0x920   :  { %v683_v23 = vpop.f32.mrb[12].mxu1 }
 0x921   :  { %v689_v25 = vadd.f32 %v1487_v21, %v683_v23  ;;  %v1623_v26 = vpop.f32.mrb[13].mxu1 }
 0x922   :  { %v686_v28 = vpop.f32.mrb[14].mxu1 }
 0x923   :  { %1756 = vtanh.f32 %v689_v25  ;;  %v1624_v29 = vpop.f32.mrb[15].mxu1  ;;  %v1489_v33 = vmul.f32 -1.442695, %v689_v25 }
 0x924   :  { %1758 = vpow2.f32 %v1486_v32 }
 0x925   :  { %1760 = vpow2.f32 %v1489_v33 }
 0x929   :  { %v1755_v30 = vpop.eup %1754 }
 0x92a   :  { %612 = vrot.lane.b32.xlu0 %v1755_v30, %s1907_s26 }
 0x92d   :  { %v1757_v31 = vpop.eup %1756 }
 0x92e   :  { %699 = vrot.lane.b32.xlu1 %v1757_v31, %s1907_s26  ;;  %v1759_v34 = vpop.eup %1758 }
 0x92f   :  { %v606_v35 = vadd.f32 1.0, %v1759_v34  ;;  %v1761_v36 = vpop.eup %1760 }
 0x930   :  { %v693_v37 = vadd.f32 1.0, %v1761_v36 }
 0x931   :  { %1762 = vrcp.f32 %v606_v35 }
 0x932   :  { %1764 = vrcp.f32 %v693_v37 }
 0x93b   :  { %v1763_v38 = vpop.eup %1762 }
 0x93c   :  { %v1765_v42 = vpop.eup %1764  ;;  %v610_v46 = vmul.f32 %v1763_v38, %v2083_v61 }
 0x93d   :  { %v697_v49 = vmul.f32 %v1765_v42, %v2087_v5 }
 0x99c   :  { %v613_v39 = vpop.permute.xlu0 %612 }
 0x99d   :  { %v615_v40 = vmul.f32 %v1763_v38, %v613_v39 }
 0x99f   :  { %617 = vrot.lane.b32.xlu0 %v615_v40, %s1908_s27 }
 0x9a0   :  { %v700_v43 = vpop.permute.xlu1 %699 }
 0x9a1   :  { %v702_v45 = vmul.f32 %v1765_v42, %v700_v43 }
 0x9a3   :  { %704 = vrot.lane.b32.xlu1 %v702_v45, %s1908_s27 }
 0xa11   :  { %v618_v47 = vpop.permute.xlu0 %617 }
 0xa12   :  { %v2127_v48 = vadd.f32 %v618_v47, %v610_v46 }
 0xa14   :  { %1766 = vtanh.f32 %v2127_v48 }
 0xa15   :  { %v705_v50 = vpop.permute.xlu1 %704 }
 0xa16   :  { %v2131_v51 = vadd.f32 %v705_v50, %v697_v49 }
 0xa18   :  { %1768 = vtanh.f32 %v2131_v51 }
 0xa1e   :  { %v1767_v52 = vpop.eup %1766 }
 0xa1f   :  { %623 = vrot.lane.b32.xlu0 %v1767_v52, %s1907_s26 }
 0xa22   :  { %v1769_v53 = vpop.eup %1768 }
 0xa23   :  { %710 = vrot.lane.b32.xlu1 %v1769_v53, %s1907_s26 }
 0xa91   :  { %v624_v54 = vpop.permute.xlu0 %623 }
 0xa92   :  { %v2136_v55 = vmul.f32 %v1763_v38, %v624_v54 }
 0xa94   :  { %v728_v56 = vpack.c.bf16 %v2136_v55, %v2136_v55 }
 0xa95   :  { %v711_v57 = vpop.permute.xlu1 %710 }
 0xa96   :  { %v2140_v58 = vmul.f32 %v1765_v42, %v711_v57  ;;  %730 = vrot.lane.b32.xlu0 %v728_v56, %s1908_s27  ;;  %v1499_v57 = vld [vmem:[%s2390_s0 + $0xa] sm:$0x3] }
 0xa98   :  { %v813_v59 = vpack.c.bf16 %v2140_v58, %v2140_v58 }
 0xa9a   :  { %815 = vrot.lane.b32.xlu1 %v813_v59, %s1908_s27 }
 0xb08   :  { %v731_v60 = vpop.permute.xlu0 %730 }
 0xb09   :  { %1630 = vmatmul.mubr.msk.bf16.vlgmr.msra.gmra.mrb[16].mxu0 %vm34_vm1, %v731_v60 }
 0xb0a   :  { %1642 = vmatpush3.bf16.msra.mxu0 %v1943_v0  ;;  %1645 = vmatprep.mubr.msk.bf16.mxu0 %vm1905_vm0, %v1904_v1 }
 0xb0b   :  { %1643 = vmatprep.subr.bf16.mxu0 %v1904_v1 }
 0xb0c   :  { %v816_v61 = vpop.permute.xlu1 %815 }
 0xb0d   :  { %1638 = vmatmul.mubr.msk.bf16.vlgmr.msra.gmra.mrb[16].mxu1 %vm34_vm1, %v816_v61 }
 0xb0e   :  { %1650 = vmatpush3.bf16.msra.mxu1 %v1950_v2  ;;  %1644 = vmatpush3.bf16.msra.mxu0 %v1956_v3 }
 0xb0f   :  { %1651 = vmatprep.subr.bf16.mxu1 %v1904_v1  ;;  %1653 = vmatprep.mubr.msk.bf16.mxu1 %vm1905_vm0, %v1904_v1 }
 0xb10   :  { %1657 = vmatprep.subr.bf16.mxu0 %v1904_v1 }
 0xb12   :  { %1652 = vmatpush3.bf16.msra.mxu1 %v1965_v4 }
 0xb13   :  { %1665 = vmatprep.subr.bf16.mxu1 %v1904_v1 }
 0xbdc   :  { %v769_v63 = vpop.f32.mrb[16].mxu0 }
 0xbdd   :  { %v775_v5 = vadd.f32 %v1490_v62, %v769_v63  ;;  %v1631_v6 = vpop.f32.mrb[17].mxu0 }
 0xbde   :  { %v772_v7 = vpop.f32.mrb[18].mxu0 }
 0xbdf   :  { %1770 = vtanh.f32 %v775_v5  ;;  %v1632_v10 = vpop.f32.mrb[19].mxu0  ;;  %v1492_v19 = vmul.f32 -1.442695, %v775_v5 }
 0xbe0   :  { %v854_v11 = vpop.f32.mrb[16].mxu1 }
 0xbe1   :  { %v860_v13 = vadd.f32 %v1493_v8, %v854_v11  ;;  %v1639_v14 = vpop.f32.mrb[17].mxu1 }
 0xbe2   :  { %v857_v15 = vpop.f32.mrb[18].mxu1 }
 0xbe3   :  { %1772 = vtanh.f32 %v860_v13  ;;  %v1640_v16 = vpop.f32.mrb[19].mxu1  ;;  %v1495_v20 = vmul.f32 -1.442695, %v860_v13 }
 0xbe4   :  { %1774 = vpow2.f32 %v1492_v19 }
 0xbe5   :  { %1776 = vpow2.f32 %v1495_v20 }
 0xbe9   :  { %v1771_v17 = vpop.eup %1770 }
 0xbea   :  { %785 = vrot.lane.b32.xlu0 %v1771_v17, %s1907_s26 }
 0xbed   :  { %v1773_v18 = vpop.eup %1772 }
 0xbee   :  { %870 = vrot.lane.b32.xlu1 %v1773_v18, %s1907_s26  ;;  %v1775_v21 = vpop.eup %1774 }
 0xbef   :  { %v779_v22 = vadd.f32 1.0, %v1775_v21  ;;  %v1777_v23 = vpop.eup %1776 }
 0xbf0   :  { %v864_v25 = vadd.f32 1.0, %v1777_v23 }
 0xbf1   :  { %1778 = vrcp.f32 %v779_v22 }
 0xbf2   :  { %1780 = vrcp.f32 %v864_v25 }
 0xbfb   :  { %v1779_v26 = vpop.eup %1778 }
 0xbfc   :  { %v1781_v30 = vpop.eup %1780  ;;  %v783_v33 = vmul.f32 %v1779_v26, %v2127_v48 }
 0xbfd   :  { %v868_v36 = vmul.f32 %v1781_v30, %v2131_v51  ;;  %v1496_v51 = vld [vmem:[%s2390_s0 + $0x14] sm:$0x3] }
 0xc5c   :  { %v786_v28 = vpop.permute.xlu0 %785 }
 0xc5d   :  { %v788_v29 = vmul.f32 %v1779_v26, %v786_v28 }
 0xc5f   :  { %790 = vrot.lane.b32.xlu0 %v788_v29, %s1908_s27 }
 0xc60   :  { %v871_v31 = vpop.permute.xlu1 %870 }
 0xc61   :  { %v873_v32 = vmul.f32 %v1781_v30, %v871_v31 }
 0xc63   :  { %875 = vrot.lane.b32.xlu1 %v873_v32, %s1908_s27 }
 0xcd1   :  { %v791_v34 = vpop.permute.xlu0 %790 }
 0xcd2   :  { %v2171_v35 = vadd.f32 %v791_v34, %v783_v33 }
 0xcd4   :  { %1782 = vtanh.f32 %v2171_v35 }
 0xcd5   :  { %v876_v37 = vpop.permute.xlu1 %875 }
 0xcd6   :  { %v2175_v38 = vadd.f32 %v876_v37, %v868_v36 }
 0xcd8   :  { %1784 = vtanh.f32 %v2175_v38 }
 0xcde   :  { %v1783_v39 = vpop.eup %1782 }
 0xcdf   :  { %796 = vrot.lane.b32.xlu0 %v1783_v39, %s1907_s26 }
 0xce2   :  { %v1785_v40 = vpop.eup %1784 }
 0xce3   :  { %881 = vrot.lane.b32.xlu1 %v1785_v40, %s1907_s26 }
 0xd51   :  { %v797_v42 = vpop.permute.xlu0 %796 }
 0xd52   :  { %v2180_v43 = vmul.f32 %v1779_v26, %v797_v42 }
 0xd54   :  { %v898_v45 = vpack.c.bf16 %v2180_v43, %v2180_v43 }
 0xd55   :  { %v882_v46 = vpop.permute.xlu1 %881 }
 0xd56   :  { %v2184_v47 = vmul.f32 %v1781_v30, %v882_v46  ;;  %900 = vrot.lane.b32.xlu0 %v898_v45, %s1908_s27 }
 0xd58   :  { %v983_v48 = vpack.c.bf16 %v2184_v47, %v2184_v47 }
 0xd5a   :  { %985 = vrot.lane.b32.xlu1 %v983_v48, %s1908_s27 }
 0xdc8   :  { %v901_v49 = vpop.permute.xlu0 %900 }
 0xdc9   :  { %1646 = vmatmul.mubr.msk.bf16.vlgmr.msra.gmra.mrb[20].mxu0 %vm34_vm1, %v901_v49 }
 0xdca   :  { %1658 = vmatpush3.bf16.msra.mxu0 %v1943_v0  ;;  %1661 = vmatprep.mubr.msk.bf16.mxu0 %vm1905_vm0, %v1904_v1 }
 0xdcb   :  { %1659 = vmatprep.subr.bf16.mxu0 %v1904_v1 }
 0xdcc   :  { %v986_v50 = vpop.permute.xlu1 %985 }
 0xdcd   :  { %1654 = vmatmul.mubr.msk.bf16.vlgmr.msra.gmra.mrb[20].mxu1 %vm34_vm1, %v986_v50 }
 0xdce   :  { %1666 = vmatpush3.bf16.msra.mxu1 %v1950_v2  ;;  %1660 = vmatpush3.bf16.msra.mxu0 %v1956_v3 }
 0xdcf   :  { %1667 = vmatprep.subr.bf16.mxu1 %v1904_v1  ;;  %1669 = vmatprep.mubr.msk.bf16.mxu1 %vm1905_vm0, %v1904_v1 }
 0xdd0   :  { %1673 = vmatprep.subr.bf16.mxu0 %v1904_v1 }
 0xdd2   :  { %1668 = vmatpush3.bf16.msra.mxu1 %v1965_v4 }
 0xdd3   :  { %1681 = vmatprep.subr.bf16.mxu1 %v1904_v1 }
 0xe9c   :  { %v939_v52 = vpop.f32.mrb[20].mxu0 }
 0xe9d   :  { %v945_v53 = vadd.f32 %v1496_v51, %v939_v52  ;;  %v1647_v54 = vpop.f32.mrb[21].mxu0 }
 0xe9e   :  { %v942_v56 = vpop.f32.mrb[22].mxu0 }
 0xe9f   :  { %1786 = vtanh.f32 %v945_v53  ;;  %v1648_v59 = vpop.f32.mrb[23].mxu0  ;;  %v1498_v8 = vmul.f32 -1.442695, %v945_v53 }
 0xea0   :  { %v1024_v60 = vpop.f32.mrb[20].mxu1 }
 0xea1   :  { %v1030_v61 = vadd.f32 %v1499_v57, %v1024_v60  ;;  %v1655_v62 = vpop.f32.mrb[21].mxu1 }
 0xea2   :  { %v1027_v63 = vpop.f32.mrb[22].mxu1 }
 0xea3   :  { %1788 = vtanh.f32 %v1030_v61  ;;  %v1656_v5 = vpop.f32.mrb[23].mxu1  ;;  %v1501_v10 = vmul.f32 -1.442695, %v1030_v61 }
 0xea4   :  { %1790 = vpow2.f32 %v1498_v8 }
 0xea5   :  { %1792 = vpow2.f32 %v1501_v10 }
 0xea9   :  { %v1787_v6 = vpop.eup %1786 }
 0xeaa   :  { %955 = vrot.lane.b32.xlu0 %v1787_v6, %s1907_s26 }
 0xead   :  { %v1789_v7 = vpop.eup %1788 }
 0xeae   :  { %1040 = vrot.lane.b32.xlu1 %v1789_v7, %s1907_s26  ;;  %v1791_v11 = vpop.eup %1790 }
 0xeaf   :  { %v949_v13 = vadd.f32 1.0, %v1791_v11  ;;  %v1793_v14 = vpop.eup %1792 }
 0xeb0   :  { %v1034_v15 = vadd.f32 1.0, %v1793_v14 }
 0xeb1   :  { %1794 = vrcp.f32 %v949_v13 }
 0xeb2   :  { %1796 = vrcp.f32 %v1034_v15 }
 0xebb   :  { %v1795_v16 = vpop.eup %1794 }
 0xebc   :  { %v1797_v19 = vpop.eup %1796  ;;  %v953_v22 = vmul.f32 %v1795_v16, %v2171_v35 }
 0xebd   :  { %v1038_v26 = vmul.f32 %v1797_v19, %v2175_v38 }
 0xf1c   :  { %v956_v17 = vpop.permute.xlu0 %955 }
 0xf1d   :  { %v958_v18 = vmul.f32 %v1795_v16, %v956_v17 }
 0xf1f   :  { %960 = vrot.lane.b32.xlu0 %v958_v18, %s1908_s27 }
 0xf20   :  { %v1041_v20 = vpop.permute.xlu1 %1040 }
 0xf21   :  { %v1043_v21 = vmul.f32 %v1797_v19, %v1041_v20 }
 0xf23   :  { %1045 = vrot.lane.b32.xlu1 %v1043_v21, %s1908_s27 }
 0xf91   :  { %v961_v23 = vpop.permute.xlu0 %960 }
 0xf92   :  { %v2215_v25 = vadd.f32 %v961_v23, %v953_v22 }
 0xf94   :  { %1798 = vtanh.f32 %v2215_v25 }
 0xf95   :  { %v1046_v28 = vpop.permute.xlu1 %1045 }
 0xf96   :  { %v2219_v29 = vadd.f32 %v1046_v28, %v1038_v26  ;;  %v1508_v28 = vld [vmem:[%s2390_s0 + $0x1c] sm:$0x3] }
 0xf98   :  { %1800 = vtanh.f32 %v2219_v29 }
 0xf9e   :  { %v1799_v30 = vpop.eup %1798 }
 0xf9f   :  { %966 = vrot.lane.b32.xlu0 %v1799_v30, %s1907_s26 }
 0xfa2   :  { %v1801_v31 = vpop.eup %1800 }
 0xfa3   :  { %1051 = vrot.lane.b32.xlu1 %v1801_v31, %s1907_s26 }
0x1011   :  { %v967_v32 = vpop.permute.xlu0 %966 }
0x1012   :  { %v2224_v33 = vmul.f32 %v1795_v16, %v967_v32 }
0x1014   :  { %v1068_v34 = vpack.c.bf16 %v2224_v33, %v2224_v33 }
0x1015   :  { %v1052_v35 = vpop.permute.xlu1 %1051 }
0x1016   :  { %v2228_v36 = vmul.f32 %v1797_v19, %v1052_v35  ;;  %1070 = vrot.lane.b32.xlu0 %v1068_v34, %s1908_s27  ;;  %v1322_v34 = vld [vmem:[%s2390_s0 + $0x2] sm:$0x3] }
0x1018   :  { %v1153_v37 = vpack.c.bf16 %v2228_v36, %v2228_v36 }
0x101a   :  { %1155 = vrot.lane.b32.xlu1 %v1153_v37, %s1908_s27 }
0x1088   :  { %v1071_v38 = vpop.permute.xlu0 %1070 }
0x1089   :  { %1662 = vmatmul.mubr.msk.bf16.vlgmr.msra.gmra.mrb[24].mxu0 %vm34_vm1, %v1071_v38 }
0x108a   :  { %1674 = vmatpush3.bf16.msra.mxu0 %v1943_v0  ;;  %1677 = vmatprep.mubr.msk.bf16.mxu0 %vm1905_vm0, %v1904_v1  ;;  %v1502_v0 = vld [vmem:[%s2390_s0 + $0x18] sm:$0x3] }
0x108b   :  { %1675 = vmatprep.subr.bf16.mxu0 %v1904_v1 }
0x108c   :  { %v1156_v39 = vpop.permute.xlu1 %1155 }
0x108d   :  { %1670 = vmatmul.mubr.msk.bf16.vlgmr.msra.gmra.mrb[24].mxu1 %vm34_vm1, %v1156_v39 }
0x108e   :  { %1682 = vmatpush3.bf16.msra.mxu1 %v1950_v2  ;;  %1676 = vmatpush3.bf16.msra.mxu0 %v1956_v3  ;;  %v1505_v2 = vld [vmem:[%s2390_s0 + $0x6] sm:$0x3]  ;;  %s1910_s0 = smov 96  }
0x108f   :  { %1683 = vmatprep.subr.bf16.mxu1 %v1904_v1  ;;  %1685 = vmatprep.mubr.msk.bf16.mxu1 %vm1905_vm0, %v1904_v1 }
0x1092   :  { %1684 = vmatpush3.bf16.msra.mxu1 %v1965_v4 }
0x115c   :  { %v1109_v40 = vpop.f32.mrb[24].mxu0 }
0x115d   :  { %v1115_v42 = vadd.f32 %v1502_v0, %v1109_v40  ;;  %v1663_v45 = vpop.f32.mrb[25].mxu0 }
0x115e   :  { %v1112_v46 = vpop.f32.mrb[26].mxu0 }
0x115f   :  { %1802 = vtanh.f32 %v1115_v42  ;;  %v1664_v3 = vpop.f32.mrb[27].mxu0  ;;  %v1504_v53 = vmul.f32 -1.442695, %v1115_v42 }
0x1160   :  { %v1194_v48 = vpop.f32.mrb[24].mxu1 }
0x1161   :  { %v1200_v49 = vadd.f32 %v1505_v2, %v1194_v48  ;;  %v1671_v50 = vpop.f32.mrb[25].mxu1 }
0x1162   :  { %v1197_v1 = vpop.f32.mrb[26].mxu1 }
0x1163   :  { %1804 = vtanh.f32 %v1200_v49  ;;  %v1672_v4 = vpop.f32.mrb[27].mxu1  ;;  %v1507_v54 = vmul.f32 -1.442695, %v1200_v49 }
0x1164   :  { %1806 = vpow2.f32 %v1504_v53 }
0x1165   :  { %1808 = vpow2.f32 %v1507_v54 }
0x1169   :  { %v1803_v51 = vpop.eup %1802 }
0x116a   :  { %1125 = vrot.lane.b32.xlu0 %v1803_v51, %s1907_s26 }
0x116d   :  { %v1805_v52 = vpop.eup %1804 }
0x116e   :  { %1210 = vrot.lane.b32.xlu1 %v1805_v52, %s1907_s26  ;;  %v1807_v56 = vpop.eup %1806 }
0x116f   :  { %v1119_v57 = vadd.f32 1.0, %v1807_v56  ;;  %v1809_v59 = vpop.eup %1808 }
0x1170   :  { %v1204_v60 = vadd.f32 1.0, %v1809_v59 }
0x1171   :  { %1810 = vrcp.f32 %v1119_v57 }
0x1172   :  { %1812 = vrcp.f32 %v1204_v60 }
0x117b   :  { %v1811_v61 = vpop.eup %1810 }
0x117c   :  { %v1813_v5 = vpop.eup %1812  ;;  %v1123_v8 = vmul.f32 %v1811_v61, %v2215_v25 }
0x117d   :  { %v1208_v13 = vmul.f32 %v1813_v5, %v2219_v29 }
0x11dc   :  { %v1126_v62 = vpop.permute.xlu0 %1125 }
0x11dd   :  { %v1128_v63 = vmul.f32 %v1811_v61, %v1126_v62 }
0x11df   :  { %1130 = vrot.lane.b32.xlu0 %v1128_v63, %s1908_s27  ;;  %v1909_v63 = vmov 1983009808  }
0x11e0   :  { %v1211_v6 = vpop.permute.xlu1 %1210 }
0x11e1   :  { %v1213_v7 = vmul.f32 %v1813_v5, %v1211_v6  ;;  %v107_v6 = vlaneseq }
0x11e3   :  { %1215 = vrot.lane.b32.xlu1 %v1213_v7, %s1908_s27 }
0x1251   :  { %v1131_v10 = vpop.permute.xlu0 %1130 }
0x1252   :  { %v1133_v11 = vadd.f32 %v1131_v10, %v1123_v8  ;;  %v108_v8 = vshrl.u32 %v107_v6, 7 }
0x1254   :  { %1814 = vtanh.f32 %v1133_v11 }
0x1255   :  { %v1216_v14 = vpop.permute.xlu1 %1215 }
0x1256   :  { %v1218_v15 = vadd.f32 %v1216_v14, %v1208_v13 }
0x1258   :  { %1816 = vtanh.f32 %v1218_v15 }
0x125e   :  { %v1815_v16 = vpop.eup %1814 }
0x125f   :  { %1136 = vrot.lane.b32.xlu0 %v1815_v16, %s1907_s26 }
0x1262   :  { %v1817_v17 = vpop.eup %1816 }
0x1263   :  { %1221 = vrot.lane.b32.xlu1 %v1817_v17, %s1907_s26 }
0x12d1   :  { %v1137_v18 = vpop.permute.xlu0 %1136 }
0x12d2   :  { %v2260_v19 = vmul.f32 %v1811_v61, %v1137_v18 }
0x12d4   :  { %v1238_v20 = vpack.c.bf16 %v2260_v19, %v2260_v19 }
0x12d5   :  { %v1222_v21 = vpop.permute.xlu1 %1221 }
0x12d6   :  { %v2264_v22 = vmul.f32 %v1813_v5, %v1222_v21  ;;  %1240 = vrot.lane.b32.xlu0 %v1238_v20, %s1908_s27  ;;  %v105_v5 = vunpack.c.l.s4 %v1909_v63 }
0x12d8   :  { %v1323_v23 = vpack.c.bf16 %v2264_v22, %v2264_v22  ;;  %v106_v7 = vunpack.c.0.s8 %v105_v5 }
0x12da   :  { %1325 = vrot.lane.b32.xlu1 %v1323_v23, %s1908_s27  ;;  %v109_v13 = vsub.s32 %v106_v7, %v108_v8 }
0x12dc   :  { %v373_v16 = vrot.slane %v2052_v27, %v109_v13  ;;  %v286_v17 = vrot.slane %v2048_v24, %v109_v13  ;;  %v547_v18 = vrot.slane %v2096_v12, %v109_v13  ;;  %v721_v20 = vrot.slane %v2140_v58, %v109_v13 }
0x12dd   :  { %v807_v24 = vrot.slane %v2180_v43, %v109_v13  ;;  %v892_v12 = vrot.slane %v2184_v47, %v109_v13  ;;  %v1062_v58 = vrot.slane %v2228_v36, %v109_v13  ;;  %v1232_v47 = vrot.slane %v2264_v22, %v109_v13 }
0x1348   :  { %v1241_v25 = vpop.permute.xlu0 %1240 }
0x1349   :  { %1678 = vmatmul.mubr.msk.bf16.vlgmr.msra.gmra.mrb[28].mxu0 %vm34_vm1, %v1241_v25 }
0x134c   :  { %v1326_v26 = vpop.permute.xlu1 %1325 }
0x134d   :  { %1686 = vmatmul.mubr.msk.bf16.vlgmr.msra.gmra.mrb[28].mxu1 %vm34_vm1, %v1326_v26 }
0x141c   :  { %v1279_v29 = vpop.f32.mrb[28].mxu0 }
0x141d   :  { %v1285_v30 = vadd.f32 %v1508_v28, %v1279_v29  ;;  %v1679_v31 = vpop.f32.mrb[29].mxu0  ;;  %v1147_v29 = vrot.slane %v2260_v19, %v109_v13 }
0x141e   :  { %v1282_v32 = vpop.f32.mrb[30].mxu0 }
0x141f   :  { %1818 = vtanh.f32 %v1285_v30  ;;  %v1680_v35 = vpop.f32.mrb[31].mxu0  ;;  %v1510_v46 = vmul.f32 -1.442695, %v1285_v30 }
0x1420   :  { %v1364_v37 = vpop.f32.mrb[28].mxu1 }
0x1421   :  { %v1370_v38 = vadd.f32 %v1364_v37, %v1322_v34  ;;  %v1687_v39 = vpop.f32.mrb[29].mxu1 }
0x1422   :  { %v1367_v0 = vpop.f32.mrb[30].mxu1 }
0x1423   :  { %1820 = vtanh.f32 %v1370_v38  ;;  %v1688_v40 = vpop.f32.mrb[31].mxu1  ;;  %v1512_v2 = vmul.f32 -1.442695, %v1370_v38 }
0x1424   :  { %1822 = vpow2.f32 %v1510_v46 }
0x1425   :  { %1824 = vpow2.f32 %v1512_v2 }
0x1429   :  { %v1819_v42 = vpop.eup %1818 }
0x142a   :  { %1295 = vrot.lane.b32.xlu0 %v1819_v42, %s1907_s26 }
0x142d   :  { %v1821_v45 = vpop.eup %1820 }
0x142e   :  { %1380 = vrot.lane.b32.xlu1 %v1821_v45, %s1907_s26  ;;  %v1823_v3 = vpop.eup %1822 }
0x142f   :  { %v1289_v48 = vadd.f32 1.0, %v1823_v3  ;;  %v1825_v49 = vpop.eup %1824 }
0x1430   :  { %v1374_v50 = vadd.f32 1.0, %v1825_v49 }
0x1431   :  { %1826 = vrcp.f32 %v1289_v48 }
0x1432   :  { %1828 = vrcp.f32 %v1374_v50 }
0x143b   :  { %v1827_v1 = vpop.eup %1826 }
0x143c   :  { %v1829_v52 = vpop.eup %1828  ;;  %v1293_v56 = vmul.f32 %v1827_v1, %v1133_v11  ;;  %v198_v11 = vrot.slane %v2008_v44, %v109_v13  ;;  %v460_v44 = vrot.slane %v2092_v9, %v109_v13  ;;  %v977_v9 = vrot.slane %v2224_v33, %v109_v13 }
0x143d   :  { %v1378_v60 = vmul.f32 %v1829_v52, %v1218_v15  ;;  %v110_v15 = vrot.slane %v2004_v41, %v109_v13  ;;  %v634_v41 = vrot.slane %v2136_v55, %v109_v13 }
0x149c   :  { %v1296_v4 = vpop.permute.xlu0 %1295 }
0x149d   :  { %v1298_v51 = vmul.f32 %v1827_v1, %v1296_v4 }
0x149f   :  { %1300 = vrot.lane.b32.xlu0 %v1298_v51, %s1908_s27 }
0x14a0   :  { %v1381_v53 = vpop.permute.xlu1 %1380 }
0x14a1   :  { %v1383_v54 = vmul.f32 %v1829_v52, %v1381_v53 }
0x14a3   :  { %1385 = vrot.lane.b32.xlu1 %v1383_v54, %s1908_s27 }
0x1511   :  { %v1301_v57 = vpop.permute.xlu0 %1300 }
0x1512   :  { %v1303_v59 = vadd.f32 %v1301_v57, %v1293_v56 }
0x1514   :  { %1830 = vtanh.f32 %v1303_v59  ;;  %v1416_v27 = vrot.slane %v1303_v59, %v109_v13 }
0x1515   :  { %v1386_v61 = vpop.permute.xlu1 %1385 }
0x1516   :  { %v2282_v62 = vadd.f32 %v1386_v61, %v1378_v60 }
0x1518   :  { %1832 = vtanh.f32 %v2282_v62 }
0x151e   :  { %v1831_v10 = vpop.eup %1830 }
0x151f   :  { %1306 = vrot.lane.b32.xlu0 %v1831_v10, %s1907_s26 }
0x1522   :  { %v1833_v14 = vpop.eup %1832 }
0x1523   :  { %1391 = vrot.lane.b32.xlu1 %v1833_v14, %s1907_s26  ;;  %199 = vrot.lane.b32.xlu0 %v198_v11, %s1907_s26 }
0x1527   :  { %111 = vrot.lane.b32.xlu1 %v110_v15, %s1908_s27  ;;  %374 = vrot.lane.b32.xlu0 %v373_v16, %s1907_s26 }
0x152b   :  { %287 = vrot.lane.b32.xlu1 %v286_v17, %s1908_s27  ;;  %548 = vrot.lane.b32.xlu0 %v547_v18, %s1907_s26 }
0x152f   :  { %461 = vrot.lane.b32.xlu1 %v460_v44, %s1908_s27  ;;  %722 = vrot.lane.b32.xlu0 %v721_v20, %s1907_s26 }
0x1533   :  { %635 = vrot.lane.b32.xlu1 %v634_v41, %s1908_s27  ;;  %1417 = vrot.lane.b32.xlu0 %v1416_v27, %s1910_s0 }
0x1537   :  { %808 = vrot.lane.b32.xlu1 %v807_v24, %s1908_s27  ;;  %893 = vrot.lane.b32.xlu0 %v892_v12, %s1907_s26 }
0x153b   :  { %978 = vrot.lane.b32.xlu1 %v977_v9, %s1908_s27  ;;  %1063 = vrot.lane.b32.xlu0 %v1062_v58, %s1907_s26 }
0x1591   :  { %v1307_v55 = vpop.permute.xlu0 %1306 }
0x1592   :  { %v1309_v21 = vmul.f32 %v1827_v1, %v1307_v55 }
0x1594   :  { %v1317_v23 = vrot.slane %v1309_v21, %v109_v13 }
0x1595   :  { %v1392_v25 = vpop.permute.xlu1 %1391  ;;  %v200_v43 = vpop.permute.xlu0 %199 }
0x1596   :  { %v1394_v26 = vmul.f32 %v1829_v52, %v1392_v25  ;;  %204 = vst.msk [vmem:[#allocation2 + $0xe] sm:$0x3] %vm203_vm2, %v200_v43  ;;  %1318 = vrot.lane.b32.xlu0 %v1317_v23, %s1908_s27 }
0x1598   :  { %v1402_v33 = vrot.slane %v1394_v26, %v109_v13 }
0x1599   :  { %v112_v36 = vpop.permute.xlu1 %111  ;;  %v375_v28 = vpop.permute.xlu0 %374 }
0x159a   :  { %115 = vst.msk [vmem:[#allocation2] sm:$0x3] %vm114_vm3, %v112_v36  ;;  %1403 = vrot.lane.b32.xlu1 %v1402_v33, %s1907_s26  ;;  %1233 = vrot.lane.b32.xlu0 %v1232_v47, %s1907_s26  ;;  %s1911_s26 = smov [#allocation4]  }
0x159b   :  { %378 = vst.msk [vmem:[#allocation2 + $0xc] sm:$0x3] %vm203_vm2, %v375_v28  ;;  %s1440_s5 = sshll.u32 %s1911_s26, 4  ;;  %s1441_s5 = int_to_ptr.vmem [resolvable:$true] %s1440_s5 }
0x159c   :  { %s1834_s10 = scalar_lea.vmem %s1441_s5, 32  ;;  %p1839_p1 = scmp.lt.s32.totalorder %s1441_s5, %s1441_s5 }
0x159d   :  { %v288_v30 = vpop.permute.xlu1 %287  ;;  %v549_v31 = vpop.permute.xlu0 %548  ;;  %p1835_p0 = scmp.ne.s32.totalorder %s1441_s5, %s1834_s10  ;;  %p1840_p2 = scmp.lt.s32.totalorder %s1834_s10, %s1834_s10 }
0x159e   :  { %291 = vst.msk [vmem:[#allocation2 + $0x2] sm:$0x3] %vm114_vm3, %v288_v30  ;;  %1148 = vrot.lane.b32.xlu1 %v1147_v29, %s1908_s27 }
0x159f   :  { %552 = vst.msk [vmem:[#allocation2 + $0xa] sm:$0x3] %vm203_vm2, %v549_v31  ;;  %p1841_p3 = por %p1840_p2, %p1839_p1 }
0x15a1   :  { %v462_v22 = vpop.permute.xlu1 %461  ;;  %v723_v32 = vpop.permute.xlu0 %722  ;;  %p1842_p4 = pnand %p1841_p3, %p1835_p0 }
0x15a2   :  { %465 = vst.msk [vmem:[#allocation2 + $0x4] sm:$0x3] %vm114_vm3, %v462_v22 }
0x15a3   :  { %726 = vst.msk [vmem:[#allocation2 + $0x8] sm:$0x3] %vm203_vm2, %v723_v32 }
0x15a5   :  { %v636_v34 = vpop.permute.xlu1 %635  ;;  %v1418_v35 = vpop.permute.xlu0 %1417 }
0x15a6   :  { %639 = vst.msk [vmem:[#allocation2 + $0x6] sm:$0x3] %vm114_vm3, %v636_v34  ;;  %1420 = vst.msk [vmem:[#allocation6] sm:$0x3] %vm114_vm3, %v1418_v35 }
0x15a7   :  { %1421 = vst.msk [vmem:[#allocation6] sm:$0x3] %vm203_vm2, %v2282_v62 }
0x15a9   :  { %v809_v19 = vpop.permute.xlu1 %808  ;;  %v894_v37 = vpop.permute.xlu0 %893 }
0x15aa   :  { %811 = vst.msk [vmem:[#allocation2 + $0x8] sm:$0x3] %vm114_vm3, %v809_v19 }
0x15ab   :  { %896 = vst.msk [vmem:[#allocation2 + $0x6] sm:$0x3] %vm203_vm2, %v894_v37 }
0x15ad   :  { %v979_v38 = vpop.permute.xlu1 %978  ;;  %v1064_v39 = vpop.permute.xlu0 %1063 }
0x15ae   :  { %981 = vst.msk [vmem:[#allocation2 + $0xa] sm:$0x3] %vm114_vm3, %v979_v38 }
0x15af   :  { %1066 = vst.msk [vmem:[#allocation2 + $0x4] sm:$0x3] %vm203_vm2, %v1064_v39 }
0x1608   :  { %v1319_v0 = vpop.permute.xlu0 %1318 }
0x1609   :  { %1321 = vst.msk [vmem:[#allocation2 + $0xe] sm:$0x3] %vm114_vm3, %v1319_v0  ;;  %1407 = vst.msk [vmem:[#allocation4] sm:$0x3] %vm114_vm3, %v1319_v0 }
0x160c   :  { %v1404_v40 = vpop.permute.xlu1 %1403  ;;  %v1234_v42 = vpop.permute.xlu0 %1233 }
0x160d   :  { %1406 = vst.msk [vmem:[#allocation2] sm:$0x3] %vm203_vm2, %v1404_v40  ;;  %1408 = vst.msk [vmem:[#allocation4] sm:$0x3] %vm203_vm2, %v1404_v40 }
0x160e   :  { %1236 = vst.msk [vmem:[#allocation2 + $0x2] sm:$0x3] %vm203_vm2, %v1234_v42 }
0x160f   :  { %1845 = shalt.err (!%p1842_p4)
}
0x1610   :  { %s1846_s13 = scalar_lea.hbm %s2393_s3, 32 }
0x1611   :  { %p1847_p5 = scmp.ne.s32.totalorder %s2393_s3, %s1846_s13  ;;  %p1850_p6 = scmp.lt.u32.totalorder %s1846_s13, %s2393_s3 }
0x1613   :  { %p1852_p7 = pnand %p1850_p6, %p1847_p5 }
0x1615   :  { %1855 = shalt.err (!%p1852_p7)
}
0x1616   :  { %1443 = dma.vmem_to_hbm [thread:$0]  %s1441_s5, 32, %s2393_s3, [#allocation5]  }
0x1617   :  { %s1856_s20 = scalar_lea.vmem %s2334_s7, 32  ;;  %p1861_p9 = scmp.lt.s32.totalorder %s2334_s7, %s2334_s7 }
0x1618   :  { %p1857_p8 = scmp.ne.s32.totalorder %s2334_s7, %s1856_s20  ;;  %p1862_p10 = scmp.lt.s32.totalorder %s1856_s20, %s1856_s20 }
0x161a   :  { %p1863_p11 = por %p1862_p10, %p1861_p9 }
0x161c   :  { %p1864_p12 = pnand %p1863_p11, %p1857_p8 }
0x161e   :  { %1867 = shalt.err (!%p1864_p12)
}
0x161f   :  { %s1868_s1 = scalar_lea.hbm %s2394_s4, 32 }
0x1620   :  { %p1869_p13 = scmp.ne.s32.totalorder %s2394_s4, %s1868_s1  ;;  %p1872_p0 = scmp.lt.u32.totalorder %s1868_s1, %s2394_s4 }
0x1622   :  { %p1874_p1 = pnand %p1872_p0, %p1869_p13 }
0x1624   :  { %1877 = shalt.err (!%p1874_p1)
}
0x1625   :  { %1453 = dma.vmem_to_hbm [thread:$0]  %s2334_s7, 32, %s2394_s4, [#allocation5]   ;;  %v1149_v45 = vpop.permute.xlu1 %1148 }
0x1626   :  { %1151 = vst.msk [vmem:[#allocation2 + $0xc] sm:$0x3] %vm114_vm3, %v1149_v45  ;;  %s1878_s30 = scalar_lea.vmem %s2339_s9, 256  ;;  %p1883_p3 = scmp.lt.s32.totalorder %s2339_s9, %s2339_s9 }
0x1627   :  { %p1879_p2 = scmp.ne.s32.totalorder %s2339_s9, %s1878_s30  ;;  %p1884_p4 = scmp.lt.s32.totalorder %s1878_s30, %s1878_s30 }
0x1629   :  { %p1885_p5 = por %p1884_p4, %p1883_p3 }
0x162b   :  { %p1886_p6 = pnand %p1885_p5, %p1879_p2 }
0x162d   :  { %1889 = shalt.err (!%p1886_p6)
}
0x162e   :  { %s1890_s5 = scalar_lea.hbm %s2392_s2, 256 }
0x162f   :  { %p1891_p7 = scmp.ne.s32.totalorder %s2392_s2, %s1890_s5  ;;  %p1894_p8 = scmp.lt.u32.totalorder %s1890_s5, %s2392_s2 }
0x1631   :  { %p1896_p9 = pnand %p1894_p8, %p1891_p7 }
0x1633   :  { %1899 = shalt.err (!%p1896_p9)
}
0x1634   :  { %s1914_s10 = smov 2  }
0x1635   :  { %1433 = dma.vmem_to_hbm [thread:$0]  %s2339_s9, 256, %s2392_s2, [#allocation3], %s1908_s27, %s1908_s27, %s1914_s10  }
0x1636   :  { %1900 = dma.done.wait [#allocation3], 256  }
0x1637   :  { %1901 = vsyncadd [#allocation3], 4294967040 }
0x1638   :  { %1902 = dma.done.wait [#allocation5], 64  }
0x1639   :  { %1903 = vsyncadd [#allocation5], 4294967232 }
0x163a   :  { %1463 = vsyncpa [#allocation3], 1 }
0x163b   :  { %1464 = vsyncpa [#allocation5], 1 }

</bundles_post_ra>
